<compile_context>
chip_gen: v7x
topology: tpu7x:2x2x1
jax: 0.10.0
libtpu: 0.0.40
codegen_flags: <defaults>
</compile_context>

<pallas_src>
import functools

import jax
import jax.numpy as jnp
from jax.experimental import pallas as pl
from jax.experimental.pallas import tpu as pltpu

BN_EPS = 1e-5

_VMEM = pl.BlockSpec(memory_space=pltpu.MemorySpace.VMEM)


def _round_up(x, m):
    return ((x + m - 1) // m) * m


# ---------------------------------------------------------------------------
# Fused Pallas kernel: all ConvBlocks + classifier in one call
# ---------------------------------------------------------------------------
def net_cnn_kernel(x_ref, w_ref, gamma_ref, beta_ref, wc_ref, bc_ref, out_ref, *,
                   pool, layers):
    """Whole forward pass, VMEM-resident.

    x_ref    : (N, L, Cp)            bf16  NLC activations, channels zero-padded to Cp
    w_ref    : (layers, Cp, 3*Cp)    bf16  conv weights, per-tap column blocks [W0|W1|W2]
    gamma_ref: (layers, 1, Cp)       f32   BN scale (zero in padded channels)
    beta_ref : (layers, 1, Cp)       f32   BN shift
    wc_ref   : (Lf*Cp, Op)           bf16  classifier weight (torch flatten order baked in)
    bc_ref   : (1, Op)               f32   classifier bias (lane-padded)
    out_ref  : (N, Op)               f32   logits, lane-padded to Op (sliced outside)
    """
    n, L, cp = x_ref.shape
    lc = L
    # No f32 upcast: the activation is only ever an MXU operand, keep it bf16.
    a = x_ref[...].reshape(n * lc, cp)                          # (rows, Cp) bf16

    for i in range(layers):                                     # static unroll over blocks
        rows = n * lc
        # Conv1d(k=3, pad=1) as ONE wide MXU matmul, K = Cp (no zero-padded taps).
        z = jnp.dot(a, w_ref[i], preferred_element_type=jnp.float32)   # (rows, 3*Cp) f32
        z0 = z[:, :cp]            # tile-aligned lane slices (free views)
        z1 = z[:, cp:2 * cp]
        z2 = z[:, 2 * cp:]

        # y[l] = z0[l-1] + z1[l] + z2[l+1]: shifts are XLU sublane rolls on the
        # flattened (n*lc) axis; per-sample boundary rows are masked to zero,
        # which handles both the conv zero-padding and the cross-sample wrap.
        pos = jax.lax.broadcasted_iota(jnp.int32, (rows, cp), 0) % lc
        y = z1
        y = y + jnp.where(pos == 0, 0.0, pltpu.roll(z0, 1, axis=0))
        y = y + jnp.where(pos == lc - 1, 0.0, pltpu.roll(z2, rows - 1, axis=0))

        # BatchNorm1d, training-mode biased batch stats over (N, L), f32 math.
        # Mean-subtracted variance (two-pass) avoids catastrophic cancellation.
        # Conv bias omitted: the per-channel mean subtraction cancels it exactly.
        inv = 1.0 / rows
        mean = jnp.sum(y, axis=0, keepdims=True) * inv
        d = y - mean
        var = jnp.sum(d * d, axis=0, keepdims=True) * inv
        y = d * jax.lax.rsqrt(var + BN_EPS) * gamma_ref[i] + beta_ref[i]

        # ReLU
        y = jnp.maximum(y, 0.0)

        # MaxPool1d(kernel=stride=pool, ceil_mode=False); lc divisible by pool.
        ln = lc // pool
        pooled = jnp.max(y.reshape(n, ln, pool, cp), axis=2)    # (n, ln, Cp) f32
        lc = ln
        a = pooled.reshape(n * lc, cp).astype(jnp.bfloat16)     # bf16 carry for next MXU op

    # Flatten + classifier.  The torch channel-major flatten order is baked into
    # the row permutation of wc_ref, so a plain (N, Lf*Cp) reshape is correct.
    feat = a.reshape(n, lc * cp)                                # bf16
    out = jnp.dot(feat, wc_ref[...], preferred_element_type=jnp.float32) + bc_ref[...]
    out_ref[...] = out


# ---------------------------------------------------------------------------
# Parameter preparation (done once, outside the forward pass)
# ---------------------------------------------------------------------------
def prepare_params(params, L):
    """Re-layout torch-style params into the padded, per-tap kernel layout."""
    layers = params["layers"]
    hidden = params["hidden"]
    channels = params["channels"]
    pool = params["pool"]
    cp = _round_up(max(hidden, channels), 128)
    lf = L // (pool ** layers)

    w_list, g_list, bt_list = [], [], []
    for blk in params["blocks"]:
        w = jnp.transpose(blk["w"], (2, 1, 0))                  # (3, Cin, Cout)
        cin = w.shape[1]
        w = jnp.pad(w, ((0, 0), (0, cp - cin), (0, cp - hidden)))   # (3, Cp, Cp)
        # Per-tap column blocks [W0 | W1 | W2]; contraction dim stays Cp.
        w_list.append(jnp.concatenate([w[0], w[1], w[2]], axis=1))  # (Cp, 3*Cp)
        g_list.append(jnp.pad(blk["gamma"], (0, cp - hidden)).reshape(1, cp))
        bt_list.append(jnp.pad(blk["beta"], (0, cp - hidden)).reshape(1, cp))
        # blk["b"] (conv bias) intentionally dropped: exactly cancelled by BN batch mean.

    w_stack = jnp.stack(w_list).astype(jnp.bfloat16)            # (layers, Cp, 3*Cp)
    g_stack = jnp.stack(g_list).astype(jnp.float32)             # (layers, 1, Cp)
    bt_stack = jnp.stack(bt_list).astype(jnp.float32)           # (layers, 1, Cp)

    out_size = params["cls_w"].shape[1]
    op = _round_up(out_size, 128)
    assert params["cls_w"].shape[0] == hidden * lf
    # torch flattens (N, C, Lf) channel-major: feature index = c*Lf + l.
    # Our kernel flattens (N, Lf, Cp): row index = l*Cp + c.  Permute + pad once here.
    w3 = params["cls_w"].reshape(hidden, lf, out_size)          # [c, l, o]
    w3 = jnp.transpose(w3, (1, 0, 2))                           # [l, c, o]
    w3 = jnp.pad(w3, ((0, 0), (0, cp - hidden), (0, op - out_size)))
    wc = w3.reshape(lf * cp, op).astype(jnp.bfloat16)
    bc = jnp.pad(params["cls_b"], (0, op - out_size)).reshape(1, op).astype(jnp.float32)

    return dict(w=w_stack, gamma=g_stack, beta=bt_stack, wc=wc, bc=bc,
                pool=pool, layers=layers, cp=cp, out_size=out_size, op=op)


# ---------------------------------------------------------------------------
# VMEM budget (explicit; v7x has 64 MiB physical, 32 MiB scoped default)
# ---------------------------------------------------------------------------
def _vmem_budget_bytes(n, L, cp, layers, op, lf):
    rows = n * L
    est = rows * cp * (2 + 3 * 4 + 2 * 4)                 # bf16 carry + z(3*Cp f32) + y/d f32
    est += layers * (cp * 3 * cp * 2 + 2 * cp * 4)        # conv weights bf16 + gamma/beta
    est += lf * cp * op * 2 + (1 + n) * op * 4            # classifier weight/bias + out
    est = 4 * est + (2 << 20)                             # regalloc / pipelining headroom
    return int(max(16 << 20, min(est, 48 << 20)))


# ---------------------------------------------------------------------------
# Forward wrapper
# ---------------------------------------------------------------------------
def net_cnn_forward(x_ncl, p):
    """x_ncl: (N, C, L) -- same layout PyTorch's NetCNN.forward receives."""
    n, c, L = x_ncl.shape
    cp, pool, layers, op = p["cp"], p["pool"], p["layers"], p["op"]
    assert L % (pool ** layers) == 0, "L must be divisible by pool**layers"
    lf = L // (pool ** layers)

    x = jnp.transpose(x_ncl, (0, 2, 1))                         # NCL -> NLC
    x = jnp.pad(x, ((0, 0), (0, 0), (0, cp - c))).astype(jnp.bfloat16)

    # Advisory cost estimate so XLA schedules the surrounding transpose/pad and
    # the weight HBM->VMEM copies sensibly around the custom call.
    flops, lc = 0, L
    for _ in range(layers):
        flops += 2 * n * lc * cp * (3 * cp)
        lc //= pool
    flops += 2 * n * (lf * cp) * op
    nbytes = lambda a: a.size * a.dtype.itemsize
    bytes_accessed = (nbytes(x) + nbytes(p["w"]) + nbytes(p["gamma"]) + nbytes(p["beta"])
                      + nbytes(p["wc"]) + nbytes(p["bc"]) + n * op * 4)

    kernel = functools.partial(net_cnn_kernel, pool=pool, layers=layers)
    out = pl.pallas_call(
        kernel,
        out_shape=jax.ShapeDtypeStruct((n, op), jnp.float32),
        in_specs=[_VMEM] * 6,
        out_specs=_VMEM,
        compiler_params=pltpu.CompilerParams(
            vmem_limit_bytes=_vmem_budget_bytes(n, L, cp, layers, op, lf)),
        cost_estimate=pl.CostEstimate(flops=int(flops), transcendentals=layers * cp,
                                      bytes_accessed=int(bytes_accessed)),
    )(x, p["w"], p["gamma"], p["beta"], p["wc"], p["bc"])
    # NOTE: gridless on purpose -- training-mode BatchNorm couples the whole batch
    # and N is tiny here (see TODO in the header for the v7x two-core variant).
    return out[:, :p["out_size"]]


# ---------------------------------------------------------------------------
# Deterministic parameter init (mirrors maml_init_ / BatchNorm init)
# ---------------------------------------------------------------------------
def xavier_uniform(key, shape, fan_in, fan_out):
    bound = (6.0 / (fan_in + fan_out)) ** 0.5
    return jax.random.uniform(key, shape, jnp.float32, -bound, bound)


def init_net_cnn(key, output_size, hidden_size, layers, channels, embedding_size):
    max_pool_factor = 8 // layers
    pool = int(2 * max_pool_factor)                             # MaxPool1d kernel=stride
    blocks = []
    for i in range(layers):
        cin = channels if i == 0 else hidden_size
        key, kw, kg = jax.random.split(key, 3)
        blocks.append(dict(
            w=xavier_uniform(kw, (hidden_size, cin, 3),
                             fan_in=cin * 3, fan_out=hidden_size * 3),   # Conv1d weight
            b=jnp.zeros((hidden_size,), jnp.float32),                    # Conv1d bias = 0
            gamma=jax.random.uniform(kg, (hidden_size,), jnp.float32),   # BN weight ~ U(0,1)
            beta=jnp.zeros((hidden_size,), jnp.float32),                 # BN bias = 0
        ))
    key, kc = jax.random.split(key)
    cls_w = xavier_uniform(kc, (embedding_size, output_size),
                           fan_in=embedding_size, fan_out=output_size)
    cls_b = jnp.zeros((output_size,), jnp.float32)
    # TODO(synk): BatchNorm1d running-stat buffer updates (stateful side effect of the
    # training-mode forward) are not modeled; only the returned activations are.
    return dict(blocks=blocks, pool=pool, cls_w=cls_w, cls_b=cls_b,
                hidden=hidden_size, channels=channels, layers=layers)


# ---------------------------------------------------------------------------
# Pure-JAX f32 reference of the torch forward (for validation only)
# ---------------------------------------------------------------------------
def reference_net_cnn(x_ncl, params):
    x = x_ncl.astype(jnp.float32)
    pool = params["pool"]
    for blk in params["blocks"]:
        w, gamma, beta = blk["w"], blk["gamma"], blk["beta"]
        N, Cin, Lc = x.shape
        xp = jnp.pad(x, ((0, 0), (0, 0), (1, 1)))
        y = sum(jnp.einsum("nil,oi->nol", xp[:, :, k:k + Lc], w[:, :, k]) for k in range(3))
        y = y + blk["b"][None, :, None]
        mean = jnp.mean(y, axis=(0, 2), keepdims=True)
        var = jnp.mean((y - mean) ** 2, axis=(0, 2), keepdims=True)
        y = (y - mean) * jax.lax.rsqrt(var + BN_EPS)
        y = y * gamma[None, :, None] + beta[None, :, None]
        y = jnp.maximum(y, 0.0)
        N, Co, Lc = y.shape
        x = jnp.max(y.reshape(N, Co, Lc // pool, pool), axis=-1)
    feat = x.reshape(x.shape[0], -1)
    return feat @ params["cls_w"] + params["cls_b"]


# ---------------------------------------------------------------------------
if __name__ == "__main__":
    # Small, consistent config:
    #   layers=2 -> max_pool_factor=4 -> pool stride=8; L=64 -> L_final = 64/8/8 = 1
    #   embedding_size = hidden * L_final = 32
    N, C, L = 2, 4, 64
    HIDDEN, LAYERS, OUT = 32, 2, 10
    POOL = 2 * (8 // LAYERS)
    EMB = HIDDEN * (L // (POOL ** LAYERS))                      # = 32

    key = jax.random.PRNGKey(0)
    key, kx = jax.random.split(key)
    x = jax.random.normal(kx, (N, C, L), jnp.float32)           # PyTorch NCL input

    params = init_net_cnn(key, OUT, HIDDEN, LAYERS, C, EMB)
    prepared = prepare_params(params, L)

    fwd = jax.jit(lambda inp: net_cnn_forward(inp, prepared))
    y = fwd(x)
    jax.block_until_ready(y)
    assert y.shape == (N, OUT), y.shape

    # Structural sanity check vs a plain-JAX f32 reference of the torch forward.
    # bf16 MXU operands bound achievable precision to ~1e-2; the loose threshold only
    # guards against structural bugs (tap order / roll direction / flatten permutation).
    ref = reference_net_cnn(x, params)
    err = float(jnp.max(jnp.abs(y - ref)))
    assert err < 0.25, f"kernel deviates from reference: max|diff|={err}"

    print("KERNEL_OK")
</pallas_src>

<mosaic_0001>
module attributes {stable_mosaic.version = 11 : i64} {
  func.func @net_cnn_kernel(%arg0: memref<2x64x128xbf16, #tpu.memory_space<vmem>>, %arg1: memref<2x128x384xbf16, #tpu.memory_space<vmem>>, %arg2: memref<2x1x128xf32, #tpu.memory_space<vmem>>, %arg3: memref<2x1x128xf32, #tpu.memory_space<vmem>>, %arg4: memref<128x128xbf16, #tpu.memory_space<vmem>>, %arg5: memref<1x128xf32, #tpu.memory_space<vmem>>, %arg6: memref<2x128xf32, #tpu.memory_space<vmem>>) attributes {dimension_semantics = [], scalar_prefetch = 0 : i64, scratch_operands = 0 : i64, tpu.core_type = #tpu.core_type<tc>} {
    %c0 = arith.constant 0 : index
    %c0_0 = arith.constant 0 : index
    %c0_1 = arith.constant 0 : index
    %0 = vector.load %arg0[%c0, %c0_0, %c0_1] : memref<2x64x128xbf16, #tpu.memory_space<vmem>>, vector<2x64x128xbf16>
    %1 = vector.shape_cast %0 : vector<2x64x128xbf16> to vector<128x128xbf16>
    %c0_2 = arith.constant 0 : index
    %c0_3 = arith.constant 0 : index
    %c0_4 = arith.constant 0 : index
    %2 = vector.load %arg1[%c0_2, %c0_3, %c0_4] : memref<2x128x384xbf16, #tpu.memory_space<vmem>>, vector<1x128x384xbf16>
    %3 = vector.shape_cast %2 : vector<1x128x384xbf16> to vector<128x384xbf16>
    %cst = arith.constant dense<0.000000e+00> : vector<128x384xf32>
    %4 = tpu.matmul %1, %3, %cst {dimension_numbers = #tpu.dot_dimension_numbers<[1], [0], [0], [1], [0, 0, 1, 1], [], []>} : vector<128x128xbf16>, vector<128x384xbf16>, vector<128x384xf32> -> vector<128x384xf32>
    %5 = vector.extract_strided_slice %4 {offsets = [0, 0], sizes = [128, 128], strides = [1, 1]} : vector<128x384xf32> to vector<128x128xf32>
    %6 = vector.extract_strided_slice %4 {offsets = [0, 128], sizes = [128, 128], strides = [1, 1]} : vector<128x384xf32> to vector<128x128xf32>
    %7 = vector.extract_strided_slice %4 {offsets = [0, 256], sizes = [128, 128], strides = [1, 1]} : vector<128x384xf32> to vector<128x128xf32>
    %8 = tpu.iota {dimensions = array<i32: 0>} : vector<128x128xi32>
    %c64_i32 = arith.constant 64 : i32
    %c0_i32 = arith.constant 0 : i32
    %9 = arith.cmpi eq, %c64_i32, %c0_i32 : i32
    %c1_i32 = arith.constant 1 : i32
    %10 = arith.select %9, %c1_i32, %c64_i32 : i32
    %11 = vector.broadcast %10 : i32 to vector<128x128xi32>
    %12 = arith.remsi %8, %11 : vector<128x128xi32>
    %c0_i32_5 = arith.constant 0 : i32
    %13 = vector.broadcast %c0_i32_5 : i32 to vector<128x128xi32>
    %14 = arith.cmpi ne, %12, %13 : vector<128x128xi32>
    %c0_i32_6 = arith.constant 0 : i32
    %15 = vector.broadcast %c0_i32_6 : i32 to vector<128x128xi32>
    %16 = arith.cmpi slt, %12, %15 : vector<128x128xi32>
    %c0_i32_7 = arith.constant 0 : i32
    %17 = arith.cmpi slt, %10, %c0_i32_7 : i32
    %18 = vector.broadcast %17 : i1 to vector<128x128xi1>
    %19 = vector.broadcast %18 : vector<128x128xi1> to vector<128x128xi1>
    %20 = arith.xori %16, %19 : vector<128x128xi1>
    %21 = arith.andi %20, %14 : vector<128x128xi1>
    %22 = vector.broadcast %10 : i32 to vector<128x128xi32>
    %23 = arith.addi %12, %22 : vector<128x128xi32>
    %24 = arith.select %21, %23, %12 : vector<128x128xi1>, vector<128x128xi32>
    %c0_i32_8 = arith.constant 0 : i32
    %25 = vector.broadcast %c0_i32_8 : i32 to vector<128x128xi32>
    %26 = arith.cmpi eq, %24, %25 : vector<128x128xi32>
    %c1_i32_9 = arith.constant 1 : i32
    %27 = tpu.dynamic_rotate %5 by %c1_i32_9 dim 0 : vector<128x128xf32>, i32 -> vector<128x128xf32>
    %cst_10 = arith.constant 0.000000e+00 : f32
    %28 = vector.broadcast %cst_10 : f32 to vector<128x128xf32>
    %29 = arith.select %26, %28, %27 : vector<128x128xi1>, vector<128x128xf32>
    %30 = arith.addf %6, %29 : vector<128x128xf32>
    %c63_i32 = arith.constant 63 : i32
    %31 = vector.broadcast %c63_i32 : i32 to vector<128x128xi32>
    %32 = arith.cmpi eq, %24, %31 : vector<128x128xi32>
    %c127_i32 = arith.constant 127 : i32
    %33 = tpu.dynamic_rotate %7 by %c127_i32 dim 0 : vector<128x128xf32>, i32 -> vector<128x128xf32>
    %cst_11 = arith.constant 0.000000e+00 : f32
    %34 = vector.broadcast %cst_11 : f32 to vector<128x128xf32>
    %35 = arith.select %32, %34, %33 : vector<128x128xi1>, vector<128x128xf32>
    %36 = arith.addf %30, %35 : vector<128x128xf32>
    %cst_12 = arith.constant dense<0.000000e+00> : vector<128xf32>
    %37 = vector.multi_reduction <add>, %36, %cst_12 [0] : vector<128x128xf32> to vector<128xf32>
    %38 = vector.shape_cast %37 : vector<128xf32> to vector<1x128xf32>
    %cst_13 = arith.constant 7.812500e-03 : f32
    %39 = vector.broadcast %cst_13 : f32 to vector<1x128xf32>
    %40 = arith.mulf %38, %39 : vector<1x128xf32>
    %41 = vector.broadcast %40 : vector<1x128xf32> to vector<128x128xf32>
    %42 = arith.subf %36, %41 : vector<128x128xf32>
    %43 = arith.mulf %42, %42 : vector<128x128xf32>
    %cst_14 = arith.constant dense<0.000000e+00> : vector<128xf32>
    %44 = vector.multi_reduction <add>, %43, %cst_14 [0] : vector<128x128xf32> to vector<128xf32>
    %45 = vector.shape_cast %44 : vector<128xf32> to vector<1x128xf32>
    %cst_15 = arith.constant 7.812500e-03 : f32
    %46 = vector.broadcast %cst_15 : f32 to vector<1x128xf32>
    %47 = arith.mulf %45, %46 : vector<1x128xf32>
    %cst_16 = arith.constant 9.99999974E-6 : f32
    %48 = vector.broadcast %cst_16 : f32 to vector<1x128xf32>
    %49 = arith.addf %47, %48 : vector<1x128xf32>
    %50 = math.rsqrt %49 : vector<1x128xf32>
    %51 = vector.broadcast %50 : vector<1x128xf32> to vector<128x128xf32>
    %52 = arith.mulf %42, %51 : vector<128x128xf32>
    %c0_17 = arith.constant 0 : index
    %c0_18 = arith.constant 0 : index
    %c0_19 = arith.constant 0 : index
    %53 = vector.load %arg2[%c0_17, %c0_18, %c0_19] : memref<2x1x128xf32, #tpu.memory_space<vmem>>, vector<1x1x128xf32>
    %54 = vector.shape_cast %53 : vector<1x1x128xf32> to vector<1x128xf32>
    %55 = vector.broadcast %54 : vector<1x128xf32> to vector<128x128xf32>
    %56 = arith.mulf %52, %55 : vector<128x128xf32>
    %c0_20 = arith.constant 0 : index
    %c0_21 = arith.constant 0 : index
    %c0_22 = arith.constant 0 : index
    %57 = vector.load %arg3[%c0_20, %c0_21, %c0_22] : memref<2x1x128xf32, #tpu.memory_space<vmem>>, vector<1x1x128xf32>
    %58 = vector.shape_cast %57 : vector<1x1x128xf32> to vector<1x128xf32>
    %59 = vector.broadcast %58 : vector<1x128xf32> to vector<128x128xf32>
    %60 = arith.addf %56, %59 : vector<128x128xf32>
    %cst_23 = arith.constant 0.000000e+00 : f32
    %61 = vector.broadcast %cst_23 : f32 to vector<128x128xf32>
    %62 = arith.maximumf %60, %61 : vector<128x128xf32>
    %63 = vector.shape_cast %62 : vector<128x128xf32> to vector<2x8x8x128xf32>
    %cst_24 = arith.constant dense<0xFF800000> : vector<2x8x128xf32>
    %64 = vector.multi_reduction <maximumf>, %63, %cst_24 [2] : vector<2x8x8x128xf32> to vector<2x8x128xf32>
    %65 = vector.shape_cast %64 : vector<2x8x128xf32> to vector<16x128xf32>
    %66 = arith.truncf %65 : vector<16x128xf32> to vector<16x128xbf16>
    %c1 = arith.constant 1 : index
    %c0_25 = arith.constant 0 : index
    %c0_26 = arith.constant 0 : index
    %67 = vector.load %arg1[%c1, %c0_25, %c0_26] : memref<2x128x384xbf16, #tpu.memory_space<vmem>>, vector<1x128x384xbf16>
    %68 = vector.shape_cast %67 : vector<1x128x384xbf16> to vector<128x384xbf16>
    %cst_27 = arith.constant dense<0.000000e+00> : vector<16x384xf32>
    %69 = tpu.matmul %66, %68, %cst_27 {dimension_numbers = #tpu.dot_dimension_numbers<[1], [0], [0], [1], [0, 0, 1, 1], [], []>} : vector<16x128xbf16>, vector<128x384xbf16>, vector<16x384xf32> -> vector<16x384xf32>
    %70 = vector.extract_strided_slice %69 {offsets = [0, 0], sizes = [16, 128], strides = [1, 1]} : vector<16x384xf32> to vector<16x128xf32>
    %71 = vector.extract_strided_slice %69 {offsets = [0, 128], sizes = [16, 128], strides = [1, 1]} : vector<16x384xf32> to vector<16x128xf32>
    %72 = vector.extract_strided_slice %69 {offsets = [0, 256], sizes = [16, 128], strides = [1, 1]} : vector<16x384xf32> to vector<16x128xf32>
    %73 = tpu.iota {dimensions = array<i32: 0>} : vector<16x128xi32>
    %c8_i32 = arith.constant 8 : i32
    %c0_i32_28 = arith.constant 0 : i32
    %74 = arith.cmpi eq, %c8_i32, %c0_i32_28 : i32
    %c1_i32_29 = arith.constant 1 : i32
    %75 = arith.select %74, %c1_i32_29, %c8_i32 : i32
    %76 = vector.broadcast %75 : i32 to vector<16x128xi32>
    %77 = arith.remsi %73, %76 : vector<16x128xi32>
    %c0_i32_30 = arith.constant 0 : i32
    %78 = vector.broadcast %c0_i32_30 : i32 to vector<16x128xi32>
    %79 = arith.cmpi ne, %77, %78 : vector<16x128xi32>
    %c0_i32_31 = arith.constant 0 : i32
    %80 = vector.broadcast %c0_i32_31 : i32 to vector<16x128xi32>
    %81 = arith.cmpi slt, %77, %80 : vector<16x128xi32>
    %c0_i32_32 = arith.constant 0 : i32
    %82 = arith.cmpi slt, %75, %c0_i32_32 : i32
    %83 = vector.broadcast %82 : i1 to vector<16x128xi1>
    %84 = vector.broadcast %83 : vector<16x128xi1> to vector<16x128xi1>
    %85 = arith.xori %81, %84 : vector<16x128xi1>
    %86 = arith.andi %85, %79 : vector<16x128xi1>
    %87 = vector.broadcast %75 : i32 to vector<16x128xi32>
    %88 = arith.addi %77, %87 : vector<16x128xi32>
    %89 = arith.select %86, %88, %77 : vector<16x128xi1>, vector<16x128xi32>
    %c0_i32_33 = arith.constant 0 : i32
    %90 = vector.broadcast %c0_i32_33 : i32 to vector<16x128xi32>
    %91 = arith.cmpi eq, %89, %90 : vector<16x128xi32>
    %c1_i32_34 = arith.constant 1 : i32
    %92 = tpu.dynamic_rotate %70 by %c1_i32_34 dim 0 : vector<16x128xf32>, i32 -> vector<16x128xf32>
    %cst_35 = arith.constant 0.000000e+00 : f32
    %93 = vector.broadcast %cst_35 : f32 to vector<16x128xf32>
    %94 = arith.select %91, %93, %92 : vector<16x128xi1>, vector<16x128xf32>
    %95 = arith.addf %71, %94 : vector<16x128xf32>
    %c7_i32 = arith.constant 7 : i32
    %96 = vector.broadcast %c7_i32 : i32 to vector<16x128xi32>
    %97 = arith.cmpi eq, %89, %96 : vector<16x128xi32>
    %c15_i32 = arith.constant 15 : i32
    %98 = tpu.dynamic_rotate %72 by %c15_i32 dim 0 : vector<16x128xf32>, i32 -> vector<16x128xf32>
    %cst_36 = arith.constant 0.000000e+00 : f32
    %99 = vector.broadcast %cst_36 : f32 to vector<16x128xf32>
    %100 = arith.select %97, %99, %98 : vector<16x128xi1>, vector<16x128xf32>
    %101 = arith.addf %95, %100 : vector<16x128xf32>
    %cst_37 = arith.constant dense<0.000000e+00> : vector<128xf32>
    %102 = vector.multi_reduction <add>, %101, %cst_37 [0] : vector<16x128xf32> to vector<128xf32>
    %103 = vector.shape_cast %102 : vector<128xf32> to vector<1x128xf32>
    %cst_38 = arith.constant 6.250000e-02 : f32
    %104 = vector.broadcast %cst_38 : f32 to vector<1x128xf32>
    %105 = arith.mulf %103, %104 : vector<1x128xf32>
    %106 = vector.broadcast %105 : vector<1x128xf32> to vector<16x128xf32>
    %107 = arith.subf %101, %106 : vector<16x128xf32>
    %108 = arith.mulf %107, %107 : vector<16x128xf32>
    %cst_39 = arith.constant dense<0.000000e+00> : vector<128xf32>
    %109 = vector.multi_reduction <add>, %108, %cst_39 [0] : vector<16x128xf32> to vector<128xf32>
    %110 = vector.shape_cast %109 : vector<128xf32> to vector<1x128xf32>
    %cst_40 = arith.constant 6.250000e-02 : f32
    %111 = vector.broadcast %cst_40 : f32 to vector<1x128xf32>
    %112 = arith.mulf %110, %111 : vector<1x128xf32>
    %cst_41 = arith.constant 9.99999974E-6 : f32
    %113 = vector.broadcast %cst_41 : f32 to vector<1x128xf32>
    %114 = arith.addf %112, %113 : vector<1x128xf32>
    %115 = math.rsqrt %114 : vector<1x128xf32>
    %116 = vector.broadcast %115 : vector<1x128xf32> to vector<16x128xf32>
    %117 = arith.mulf %107, %116 : vector<16x128xf32>
    %c1_42 = arith.constant 1 : index
    %c0_43 = arith.constant 0 : index
    %c0_44 = arith.constant 0 : index
    %118 = vector.load %arg2[%c1_42, %c0_43, %c0_44] : memref<2x1x128xf32, #tpu.memory_space<vmem>>, vector<1x1x128xf32>
    %119 = vector.shape_cast %118 : vector<1x1x128xf32> to vector<1x128xf32>
    %120 = vector.broadcast %119 : vector<1x128xf32> to vector<16x128xf32>
    %121 = arith.mulf %117, %120 : vector<16x128xf32>
    %c1_45 = arith.constant 1 : index
    %c0_46 = arith.constant 0 : index
    %c0_47 = arith.constant 0 : index
    %122 = vector.load %arg3[%c1_45, %c0_46, %c0_47] : memref<2x1x128xf32, #tpu.memory_space<vmem>>, vector<1x1x128xf32>
    %123 = vector.shape_cast %122 : vector<1x1x128xf32> to vector<1x128xf32>
    %124 = vector.broadcast %123 : vector<1x128xf32> to vector<16x128xf32>
    %125 = arith.addf %121, %124 : vector<16x128xf32>
    %cst_48 = arith.constant 0.000000e+00 : f32
    %126 = vector.broadcast %cst_48 : f32 to vector<16x128xf32>
    %127 = arith.maximumf %125, %126 : vector<16x128xf32>
    %128 = vector.shape_cast %127 : vector<16x128xf32> to vector<2x1x8x128xf32>
    %cst_49 = arith.constant dense<0xFF800000> : vector<2x1x128xf32>
    %129 = vector.multi_reduction <maximumf>, %128, %cst_49 [2] : vector<2x1x8x128xf32> to vector<2x1x128xf32>
    %130 = vector.shape_cast %129 : vector<2x1x128xf32> to vector<2x128xf32>
    %131 = arith.truncf %130 : vector<2x128xf32> to vector<2x128xbf16>
    %c0_50 = arith.constant 0 : index
    %c0_51 = arith.constant 0 : index
    %132 = vector.load %arg4[%c0_50, %c0_51] : memref<128x128xbf16, #tpu.memory_space<vmem>>, vector<128x128xbf16>
    %cst_52 = arith.constant dense<0.000000e+00> : vector<2x128xf32>
    %133 = tpu.matmul %131, %132, %cst_52 {dimension_numbers = #tpu.dot_dimension_numbers<[1], [0], [0], [1], [0, 0, 1, 1], [], []>} : vector<2x128xbf16>, vector<128x128xbf16>, vector<2x128xf32> -> vector<2x128xf32>
    %c0_53 = arith.constant 0 : index
    %c0_54 = arith.constant 0 : index
    %134 = vector.load %arg5[%c0_53, %c0_54] : memref<1x128xf32, #tpu.memory_space<vmem>>, vector<1x128xf32>
    %135 = vector.broadcast %134 : vector<1x128xf32> to vector<2x128xf32>
    %136 = arith.addf %133, %135 : vector<2x128xf32>
    %c0_55 = arith.constant 0 : index
    %c0_56 = arith.constant 0 : index
    %137 = vector.load %arg6[%c0_55, %c0_56] : memref<2x128xf32, #tpu.memory_space<vmem>>, vector<2x128xf32>
    tpu.vector_store %arg6[%c0_55, %c0_56], %136 {strides = array<i32>} : memref<2x128xf32, #tpu.memory_space<vmem>>, vector<2x128xf32>,
    return
  }
}

</mosaic_0001>

<bundles_post_ra>
// kernel: _lambda_.1
= control target key start
LH: loop header
LB: loop body
LE: loop exit
PB: predicated region body
PF: predicated region fallthrough
CT: control target
= control target key end

     0   :  { %v1956_v2 = vmov 0   ;;  %s2540_s0 = inlined_call_operand.vmem [shape: bf16[2,64,128], index: 0, kind: input, shape index: {}]   ;;  %s2541_s1 = inlined_call_operand.vmem [shape: bf16[2,128,384], index: 1, kind: input, shape index: {}]   ;;  %s2542_s2 = inlined_call_operand.vmem [shape: f32[2,1,128], index: 2, kind: input, shape index: {}]   ;;  %s2543_s3 = inlined_call_operand.vmem [shape: f32[2,1,128], index: 3, kind: input, shape index: {}]   ;;  %s2544_s4 = inlined_call_operand.vmem [shape: bf16[128,128], index: 4, kind: input, shape index: {}]   ;;  %s2545_s5 = inlined_call_operand.vmem [shape: f32[1,128], index: 5, kind: input, shape index: {}]   ;;  %s2546_s6 = inlined_call_operand.hbm [shape: f32[2,128], index: 6, kind: output, shape index: {}]  }
   0x1   :  { %v1848_v0 = vld [vmem:[%s2541_s1 + $0x4] ss:$12 sps:$4 sm:$0xff]   ;;  %v1850_v1 = vld [vmem:[%s2541_s1] ss:$12 sps:$4 sm:$0xff]   ;;  %281 = vmatprep.mubr.bf16.mxu0 %v1956_v2  ;;  %v1851_v3 = vld [vmem:[%s2541_s1 + $0x8] ss:$12 sps:$4 sm:$0xff]  }
   0x2   :  { %249 = vmatprep.subr.bf16.mxu0 %v1848_v0  ;;  %v1852_v4 = vld [vmem:[%s2541_s1 + $0x1c] ss:$12 sps:$4 sm:$0xff]   ;;  %v1854_v5 = vld [vmem:[%s2541_s1 + $0x18] ss:$12 sps:$4 sm:$0xff]   ;;  %1772 = vmatprep.subr.bf16.mxu1 %v1851_v3  ;;  %v1855_v6 = vld [vmem:[%s2541_s1 + $0x20] ss:$12 sps:$4 sm:$0xff]  }
   0x3   :  { %250 = vmatpush1.bf16.msra.mxu0 %v1850_v1  ;;  %1773 = vmatpush3.bf16.msra.mxu1 %v1851_v3  ;;  %v1856_v7 = vld [vmem:[%s2541_s1 + $0x34] ss:$12 sps:$4 sm:$0xff]   ;;  %v1859_v8 = vld [vmem:[%s2541_s1 + $0x38] ss:$12 sps:$4 sm:$0xff]   ;;  %v1858_v9 = vld [vmem:[%s2541_s1 + $0x30] ss:$12 sps:$4 sm:$0xff]  }
   0x4   :  { %251 = vmatprep.subr.bf16.mxu0 %v1852_v4  ;;  %1774 = vmatprep.subr.bf16.mxu1 %v1855_v6  ;;  %v1860_v10 = vld [vmem:[%s2541_s1 + $0x4c] ss:$12 sps:$4 sm:$0xff]   ;;  %v1863_v11 = vld [vmem:[%s2541_s1 + $0x50] ss:$12 sps:$4 sm:$0xff]   ;;  %v1862_v12 = vld [vmem:[%s2541_s1 + $0x48] ss:$12 sps:$4 sm:$0xff]  }
   0x5   :  { %v1864_v13 = vld [vmem:[%s2541_s1 + $0x64] ss:$12 sps:$4 sm:$0xff]   ;;  %v1867_v14 = vld [vmem:[%s2541_s1 + $0x68] ss:$12 sps:$4 sm:$0xff]   ;;  %v1866_v15 = vld [vmem:[%s2541_s1 + $0x60] ss:$12 sps:$4 sm:$0xff]  }
   0x6   :  { %v1868_v16 = vld [vmem:[%s2541_s1 + $0x7c] ss:$12 sps:$4 sm:$0xff]   ;;  %v1870_v17 = vld [vmem:[%s2541_s1 + $0x78] ss:$12 sps:$4 sm:$0xff]   ;;  %v1871_v18 = vld [vmem:[%s2541_s1 + $0x80] ss:$12 sps:$4 sm:$0xff]  }
   0x7   :  { %252 = vmatpush1.bf16.msra.mxu0 %v1854_v5  ;;  %1775 = vmatpush3.bf16.msra.mxu1 %v1855_v6  ;;  %v1880_v19 = vld [vmem:[%s2540_s0] sm:$0xff]   ;;  %v1874_v22 = vld [vmem:[%s2541_s1 + $0x90] ss:$12 sps:$4 sm:$0xff]   ;;  %v1876_v23 = vld [vmem:[%s2541_s1 + $0xac] ss:$12 sps:$4 sm:$0xff]  }
   0x8   :  { %253 = vmatprep.subr.bf16.mxu0 %v1856_v7  ;;  %1776 = vmatprep.subr.bf16.mxu1 %v1859_v8  ;;  %v1872_v20 = vld [vmem:[%s2541_s1 + $0x94] ss:$12 sps:$4 sm:$0xff]   ;;  %v1875_v21 = vld [vmem:[%s2541_s1 + $0x98] ss:$12 sps:$4 sm:$0xff]   ;;  %v1879_v25 = vld [vmem:[%s2541_s1 + $0xb0] ss:$12 sps:$4 sm:$0xff]  }
   0x9   :  { %1788 = vmatprep.mubr.bf16.mxu1 %v1880_v19  ;;  %v1878_v24 = vld [vmem:[%s2541_s1 + $0xa8] ss:$12 sps:$4 sm:$0xff]   ;;  %v1883_v28 = vld [vmem:[%s2540_s0 + $0x18] sm:$0xff]   ;;  %v1884_v29 = vld [vmem:[%s2540_s0 + $0x20] sm:$0xff]  }
   0xa   :  { %v1881_v26 = vld [vmem:[%s2540_s0 + $0x8] sm:$0xff]   ;;  %v1882_v27 = vld [vmem:[%s2540_s0 + $0x10] sm:$0xff]  }
   0xb   :  { %254 = vmatpush1.bf16.msra.mxu0 %v1858_v9  ;;  %1777 = vmatpush3.bf16.msra.mxu1 %v1859_v8 }
   0xc   :  { %255 = vmatprep.subr.bf16.mxu0 %v1860_v10  ;;  %1778 = vmatprep.subr.bf16.mxu1 %v1863_v11 }
   0xf   :  { %256 = vmatpush1.bf16.msra.mxu0 %v1862_v12  ;;  %1779 = vmatpush3.bf16.msra.mxu1 %v1863_v11 }
  0x10   :  { %257 = vmatprep.subr.bf16.mxu0 %v1864_v13  ;;  %1780 = vmatprep.subr.bf16.mxu1 %v1867_v14 }
  0x13   :  { %258 = vmatpush1.bf16.msra.mxu0 %v1866_v15  ;;  %1781 = vmatpush3.bf16.msra.mxu1 %v1867_v14 }
  0x14   :  { %259 = vmatprep.subr.bf16.mxu0 %v1868_v16  ;;  %1782 = vmatprep.subr.bf16.mxu1 %v1871_v18 }
  0x17   :  { %260 = vmatpush1.bf16.msra.mxu0 %v1870_v17  ;;  %1783 = vmatpush3.bf16.msra.mxu1 %v1871_v18 }
  0x18   :  { %261 = vmatprep.subr.bf16.mxu0 %v1872_v20  ;;  %1784 = vmatprep.subr.bf16.mxu1 %v1875_v21 }
  0x1b   :  { %262 = vmatpush1.bf16.msra.mxu0 %v1874_v22  ;;  %1785 = vmatpush3.bf16.msra.mxu1 %v1875_v21 }
  0x1c   :  { %263 = vmatprep.subr.bf16.mxu0 %v1876_v23  ;;  %1786 = vmatprep.subr.bf16.mxu1 %v1879_v25 }
  0x1f   :  { %264 = vmatpush1.bf16.msra.mxu0 %v1878_v24  ;;  %1787 = vmatpush3.bf16.msra.mxu1 %v1879_v25 }
  0x22   :  { %282 = vmatmul.mubr.bf16.vlgmr.msra.gmra.mrb[0].mxu0 %v1880_v19  ;;  %1789 = vmatmul.mubr.bf16.vlgmr.msra.gmra.mrb[0].mxu1 %v1881_v26 }
  0x23   :  { %291 = vmatprep.mubr.bf16.mxu0 %v1956_v2  ;;  %1792 = vmatprep.mubr.bf16.mxu1 %v1882_v27 }
  0x2a   :  { %292 = vmatmul.mubr.bf16.gmra.mrb[4].mxu0 %v1881_v26 }
  0x2b   :  { %11 = vsyncpa [#allocation3], 0  ;;  %301 = vmatprep.mubr.bf16.mxu0 %v1956_v2  ;;  %1793 = vmatmul.mubr.bf16.gmra.mrb[4].mxu1 %v1883_v28  ;;  %v1885_v30 = vld [vmem:[%s2540_s0 + $0x28] sm:$0xff]   ;;  %v1886_v31 = vld [vmem:[%s2540_s0 + $0x30] sm:$0xff]   ;;  %v459_v33 = vlaneseq  ;;  %vm1958_vm6 = vmmov 0   ;;  %vm1163_vm7 = vcmask 1041409  }
  0x2c   :  { %1796 = vmatprep.mubr.bf16.mxu1 %v1884_v29  ;;  %v1887_v32 = vld [vmem:[%s2540_s0 + $0x38] sm:$0xff]   ;;  %vm1165_vm8 = vcmask 1042434   ;;  %vm1167_vm9 = vcmask 1043459   ;;  %vm1169_vm10 = vcmask 1044484   ;;  %vm1171_vm11 = vcmask 1045509   ;;  %s1959_s8 = smov [#allocation2]  }
  0x2d   :  { %v2100_v34 = vshrl.u32 %v459_v33, 7  ;;  %vm1173_vm12 = vcmask 1046534   ;;  %vm1175_vm13 = vcmask 1047559   ;;  %s1627_s9 = sshll.u32 %s1959_s8, 4  ;;  %s1628_s9 = int_to_ptr.vmem [resolvable:$true] %s1627_s9 }
  0x2e   :  { %s1932_s10 = scalar_lea.vmem %s1628_s9, 32  ;;  %p1937_p1 = scmp.lt.s32.totalorder %s1628_s9, %s1628_s9 }
  0x2f   :  { %vm700_vm0 = vcmp.lt.s32.totalorder %v2100_v34, 1  ;;  %vm781_vm1 = vcmp.lt.s32.totalorder %v2100_v34, 7  ;;  %v467_v18 = vadd.s32 56, %v2100_v34  ;;  %p1933_p0 = scmp.ne.s32.totalorder %s1628_s9, %s1932_s10  ;;  %p1938_p2 = scmp.lt.s32.totalorder %s1932_s10, %s1932_s10 }
  0x31   :  { %p1939_p3 = por %p1938_p2, %p1937_p1 }
  0x32   :  { %302 = vmatmul.mubr.bf16.gmra.mrb[8].mxu0 %v1882_v27 }
  0x33   :  { %311 = vmatprep.mubr.bf16.mxu0 %v1956_v2  ;;  %1797 = vmatmul.mubr.bf16.gmra.mrb[8].mxu1 %v1885_v30  ;;  %p1940_p4 = pnand %p1939_p3, %p1933_p0 }
  0x34   :  { %1800 = vmatprep.mubr.bf16.mxu1 %v1886_v31 }
  0x3a   :  { %312 = vmatmul.mubr.bf16.gmra.mrb[12].mxu0 %v1883_v28 }
  0x3b   :  { %321 = vmatprep.mubr.bf16.mxu0 %v1956_v2  ;;  %1801 = vmatmul.mubr.bf16.gmra.mrb[12].mxu1 %v1887_v32 }
  0x3c   :  { %1346 = vmatprep.mubr.bf16.mxu1 %v1956_v2 }
  0x42   :  { %322 = vmatmul.mubr.bf16.gmra.mrb[16].mxu0 %v1884_v29 }
  0x43   :  { %331 = vmatprep.mubr.bf16.mxu0 %v1956_v2 }
  0x4a   :  { %332 = vmatmul.mubr.bf16.gmra.mrb[20].mxu0 %v1885_v30  ;;  %v529_v30 = vand.u32 63, %v467_v18 }
  0x4b   :  { %341 = vmatprep.mubr.bf16.mxu0 %v1956_v2 }
  0x4c   :  { %vm2162_vm2 = vcmp.eq.s32.totalorder %v529_v30, 63 }
  0x52   :  { %342 = vmatmul.mubr.bf16.gmra.mrb[24].mxu0 %v1886_v31 }
  0x53   :  { %351 = vmatprep.mubr.bf16.mxu0 %v1956_v2 }
  0x5a   :  { %352 = vmatmul.mubr.bf16.gmra.mrb[28].mxu0 %v1887_v32 }
  0xf5   :  { %v2102_v35 = vpop.f32.mrb[0].mxu0  ;;  %v1790_v37 = vpop.f32.mrb[0].mxu1 }
  0xf6   :  { %v2104_v36 = vpop.f32.mrb[1].mxu0  ;;  %v684_v39 = vrot.slane %v2102_v35, 7  ;;  %v2108_v41 = vpop.f32.mrb[1].mxu1  ;;  %v767_v43 = vrot.slane %v1790_v37, 1 }
  0xf7   :  { %v287_v38 = vpop.f32.mrb[2].mxu0  ;;  %v765_v44 = vrot.slane %v2108_v41, 1  ;;  %v1791_v45 = vpop.f32.mrb[2].mxu1 }
  0xf8   :  { %v685_v40 = vrot.slane %v287_v38, 7  ;;  %v289_v42 = vpop.f32.mrb[3].mxu0  ;;  %v768_v47 = vrot.slane %v1791_v45, 1  ;;  %v399_v48 = vpop.f32.mrb[3].mxu1 }
  0xf9   :  { %v766_v50 = vrot.slane %v399_v48, 1 }
  0xfa   :  { %v715_v46 = vsel %vm700_vm0, %v684_v39, %v685_v40  ;;  %v794_v51 = vsel %vm781_vm1, %v767_v43, %v768_v47 }
  0xfb   :  { %v734_v49 = vadd.f32 %v715_v46, %v289_v42  ;;  %v795_v52 = vsel %vm781_vm1, %v766_v50, %v767_v43  ;;  %v2124_v53 = vsel %vm781_vm1, %v765_v44, %v766_v50  ;;  %v468_v50 = vadd.s32 64, %v2100_v34 }
  0xfd   :  { %v293_v54 = vpop.f32.mrb[4].mxu0  ;;  %v2126_v55 = vadd.f32 %v795_v52, %v734_v49 }
  0xfe   :  { %v686_v56 = vrot.slane %v293_v54, 7  ;;  %v295_v57 = vpop.f32.mrb[5].mxu0  ;;  %v1794_v59 = vpop.f32.mrb[4].mxu1 }
  0xff   :  { %v297_v58 = vpop.f32.mrb[6].mxu0  ;;  %v412_v63 = vpop.f32.mrb[5].mxu1  ;;  %v771_v1 = vrot.slane %v1794_v59, 1 }
 0x100   :  { %v714_v60 = vsel %vm700_vm0, %v685_v40, %v686_v56  ;;  %v687_v61 = vrot.slane %v297_v58, 7  ;;  %v299_v62 = vpop.f32.mrb[7].mxu0  ;;  %v769_v2 = vrot.slane %v412_v63, 1  ;;  %v1795_v3 = vpop.f32.mrb[6].mxu1 }
 0x101   :  { %v735_v0 = vadd.f32 %v714_v60, %v295_v57  ;;  %v772_v5 = vrot.slane %v1795_v3, 1  ;;  %v415_v6 = vpop.f32.mrb[7].mxu1 }
 0x102   :  { %v713_v4 = vsel %vm700_vm0, %v686_v56, %v687_v61  ;;  %v793_v9 = vsel %vm781_vm1, %v768_v47, %v769_v2  ;;  %v770_v10 = vrot.slane %v415_v6, 1 }
 0x103   :  { %v2132_v7 = vadd.f32 %v794_v51, %v735_v0  ;;  %v736_v8 = vadd.f32 %v713_v4, %v299_v62  ;;  %v790_v11 = vsel %vm781_vm1, %v771_v1, %v772_v5 }
 0x104   :  { %v792_v14 = vsel %vm781_vm1, %v769_v2, %v770_v10  ;;  %v791_v15 = vsel %vm781_vm1, %v770_v10, %v771_v1  ;;  %v536_v2 = vand.u32 63, %v468_v50 }
 0x105   :  { %v2138_v12 = vadd.f32 %v793_v9, %v736_v8  ;;  %v303_v13 = vpop.f32.mrb[8].mxu0 }
 0x106   :  { %v688_v16 = vrot.slane %v303_v13, 7  ;;  %v305_v17 = vpop.f32.mrb[9].mxu0  ;;  %v1798_v20 = vpop.f32.mrb[8].mxu1  ;;  %vm676_vm3 = vcmp.eq.s32.totalorder %v536_v2, 0 }
 0x107   :  { %v307_v19 = vpop.f32.mrb[10].mxu0  ;;  %v428_v24 = vpop.f32.mrb[9].mxu1  ;;  %v775_v26 = vrot.slane %v1798_v20, 1 }
 0x108   :  { %v712_v21 = vsel %vm700_vm0, %v687_v61, %v688_v16  ;;  %v689_v22 = vrot.slane %v307_v19, 7  ;;  %v309_v23 = vpop.f32.mrb[11].mxu0  ;;  %v773_v27 = vrot.slane %v428_v24, 1  ;;  %v1799_v28 = vpop.f32.mrb[10].mxu1 }
 0x109   :  { %v737_v25 = vadd.f32 %v712_v21, %v305_v17  ;;  %v776_v31 = vrot.slane %v1799_v28, 1  ;;  %v431_v32 = vpop.f32.mrb[11].mxu1 }
 0x10a   :  { %v711_v29 = vsel %vm700_vm0, %v688_v16, %v689_v22  ;;  %v789_v38 = vsel %vm781_vm1, %v772_v5, %v773_v27  ;;  %v774_v40 = vrot.slane %v431_v32, 1 }
 0x10b   :  { %v2149_v33 = vadd.f32 %v792_v14, %v737_v25  ;;  %v738_v37 = vadd.f32 %v711_v29, %v309_v23  ;;  %v786_v42 = vsel %vm781_vm1, %v775_v26, %v776_v31  ;;  %v805_v1 = vsel %vm2162_vm2, 0.0, %v789_v38 }
 0x10c   :  { %v787_v46 = vsel %vm781_vm1, %v774_v40, %v775_v26  ;;  %v788_v47 = vsel %vm781_vm1, %v773_v27, %v774_v40 }
 0x10d   :  { %v2155_v43 = vadd.f32 %v791_v15, %v738_v37  ;;  %v313_v45 = vpop.f32.mrb[12].mxu0 }
 0x10e   :  { %v690_v48 = vrot.slane %v313_v45, 7  ;;  %v315_v49 = vpop.f32.mrb[13].mxu0  ;;  %v1802_v54 = vpop.f32.mrb[12].mxu1 }
 0x10f   :  { %v317_v51 = vpop.f32.mrb[14].mxu0  ;;  %v444_v59 = vpop.f32.mrb[13].mxu1  ;;  %v779_v61 = vrot.slane %v1802_v54, 1  ;;  %v1957_v54 = vmov 0.0  }
 0x110   :  { %v710_v56 = vsel %vm700_vm0, %v689_v22, %v690_v48  ;;  %v691_v57 = vrot.slane %v317_v51, 7  ;;  %v319_v58 = vpop.f32.mrb[15].mxu0  ;;  %v777_v62 = vrot.slane %v444_v59, 1  ;;  %v1803_v63 = vpop.f32.mrb[14].mxu1  ;;  %1804 = vmatprep.subr.bf16.mxu0 %v1957_v54  ;;  %1820 = vmatprep.mubr.msk.bf16.mxu0 %vm1958_vm6, %v1957_v54 }
 0x111   :  { %v739_v60 = vadd.f32 %v710_v56, %v315_v49  ;;  %v780_v3 = vrot.slane %v1803_v63, 1  ;;  %v447_v4 = vpop.f32.mrb[15].mxu1  ;;  %v1894_v49 = vld [vmem:[%s2541_s1 + $0xc4] ss:$12 sps:$4 sm:$0xff]   ;;  %v1888_v56 = vld [vmem:[%s2541_s1 + $0xc8] ss:$12 sps:$4 sm:$0xff]  }
 0x112   :  { %v709_v0 = vsel %vm700_vm0, %v690_v48, %v691_v57  ;;  %v785_v8 = vsel %vm781_vm1, %v776_v31, %v777_v62  ;;  %v778_v9 = vrot.slane %v447_v4, 1  ;;  %1314 = vmatprep.subr.bf16.mxu1 %v1894_v49  ;;  %1805 = vmatpush3.bf16.msra.mxu0 %v1888_v56  ;;  %v480_v4 = vand.u32 63, %v2100_v34  ;;  %v1910_v49 = vld [vmem:[%s2541_s1 + $0x138] ss:$12 sps:$4 sm:$0xff]   ;;  %v1913_v56 = vld [vmem:[%s2541_s1 + $0x150] ss:$12 sps:$4 sm:$0xff]  }
 0x113   :  { %v2172_v5 = vadd.f32 %v790_v11, %v739_v60  ;;  %v740_v6 = vadd.f32 %v709_v0, %v319_v58  ;;  %v2178_v10 = vsel %vm781_vm1, %v779_v61, %v780_v3  ;;  %v2184_v13 = vsel %vm781_vm1, %v780_v3, %v765_v44  ;;  %1806 = vmatprep.subr.bf16.mxu0 %v1957_v54  ;;  %v1889_v0 = vld [vmem:[%s2541_s1 + $0xe0] ss:$12 sps:$4 sm:$0xff]  }
 0x114   :  { %v784_v11 = vsel %vm781_vm1, %v777_v62, %v778_v9  ;;  %v783_v16 = vsel %vm781_vm1, %v778_v9, %v779_v61  ;;  %v475_v61 = vadd.s32 120, %v2100_v34  ;;  %v1898_v62 = vld [vmem:[%s2541_s1 + $0xdc] ss:$12 sps:$4 sm:$0xff]   ;;  %vm2250_vm4 = vcmp.eq.s32.totalorder %v480_v4, 0 }
 0x115   :  { %v2186_v14 = vadd.f32 %v805_v1, %v740_v6  ;;  %v323_v15 = vpop.f32.mrb[16].mxu0  ;;  %v1896_v1 = vld [vmem:[%s2541_s1 + $0xd8] ss:$12 sps:$4 sm:$0xff]  }
 0x116   :  { %v692_v17 = vrot.slane %v323_v15, 7  ;;  %v325_v18 = vpop.f32.mrb[17].mxu0  ;;  %v585_v9 = vand.u32 63, %v475_v61  ;;  %1807 = vmatpush3.bf16.msra.mxu0 %v1889_v0  ;;  %v1901_v15 = vld [vmem:[%s2541_s1 + $0xf4] ss:$12 sps:$4 sm:$0xff]  }
 0x117   :  { %v327_v19 = vpop.f32.mrb[18].mxu0  ;;  %1808 = vmatprep.subr.bf16.mxu0 %v1957_v54 }
 0x118   :  { %v708_v41 = vsel %vm700_vm0, %v691_v57, %v692_v17  ;;  %v693_v20 = vrot.slane %v327_v19, 7  ;;  %v329_v21 = vpop.f32.mrb[19].mxu0  ;;  %vm764_vm5 = vcmp.eq.s32.totalorder %v585_v9, 63 }
 0x119   :  { %v725_v44 = vsel %vm676_vm3, 0.0, %v708_v41 }
 0x11a   :  { %v741_v22 = vadd.f32 %v725_v44, %v325_v18  ;;  %v707_v23 = vsel %vm700_vm0, %v692_v17, %v693_v20 }
 0x11b   :  { %v742_v24 = vadd.f32 %v707_v23, %v329_v21  ;;  %v1905_v23 = vld [vmem:[%s2541_s1 + $0x10c] ss:$12 sps:$4 sm:$0xff]  }
 0x11c   :  { %v2196_v25 = vadd.f32 %v788_v47, %v741_v22 }
 0x11d   :  { %v2198_v26 = vadd.f32 %v787_v46, %v742_v24  ;;  %v333_v27 = vpop.f32.mrb[20].mxu0 }
 0x11e   :  { %v694_v28 = vrot.slane %v333_v27, 7  ;;  %v335_v29 = vpop.f32.mrb[21].mxu0 }
 0x11f   :  { %v337_v30 = vpop.f32.mrb[22].mxu0 }
 0x120   :  { %v706_v31 = vsel %vm700_vm0, %v693_v20, %v694_v28  ;;  %v695_v32 = vrot.slane %v337_v30, 7  ;;  %v339_v37 = vpop.f32.mrb[23].mxu0 }
 0x121   :  { %v743_v38 = vadd.f32 %v706_v31, %v335_v29  ;;  %v1903_v29 = vld [vmem:[%s2541_s1 + $0x108] ss:$12 sps:$4 sm:$0xff]  }
 0x122   :  { %v705_v40 = vsel %vm700_vm0, %v694_v28, %v695_v32  ;;  %v1891_v28 = vld [vmem:[%s2541_s1 + $0x110] ss:$12 sps:$4 sm:$0xff]  }
 0x123   :  { %v2204_v45 = vadd.f32 %v786_v42, %v743_v38  ;;  %v744_v48 = vadd.f32 %v705_v40, %v339_v37  ;;  %v1892_v42 = vld [vmem:[%s2541_s1 + $0xc0] ss:$12 sps:$4 sm:$0xff]   ;;  %v1908_v38 = vld [vmem:[%s2541_s1 + $0x124] ss:$12 sps:$4 sm:$0xff]   ;;  %v1895_v40 = vld [vmem:[%s2541_s1 + $0x128] ss:$12 sps:$4 sm:$0xff]  }
 0x124   :  { %1315 = vmatpush1.bf16.msra.mxu1 %v1892_v42 }
 0x125   :  { %v2206_v47 = vadd.f32 %v785_v8, %v744_v48  ;;  %v343_v46 = vpop.f32.mrb[24].mxu0  ;;  %1316 = vmatprep.subr.bf16.mxu1 %v1898_v62  ;;  %v1912_v48 = vld [vmem:[%s2541_s1 + $0x13c] ss:$12 sps:$4 sm:$0xff]  }
 0x126   :  { %v696_v50 = vrot.slane %v343_v46, 7  ;;  %v345_v51 = vpop.f32.mrb[25].mxu0  ;;  %v1902_v46 = vld [vmem:[%s2541_s1 + $0x140] ss:$12 sps:$4 sm:$0xff]  }
 0x127   :  { %v347_v52 = vpop.f32.mrb[26].mxu0 }
 0x128   :  { %v704_v57 = vsel %vm700_vm0, %v695_v32, %v696_v50  ;;  %v697_v58 = vrot.slane %v347_v52, 7  ;;  %v349_v59 = vpop.f32.mrb[27].mxu0  ;;  %1317 = vmatpush1.bf16.msra.mxu1 %v1896_v1  ;;  %v813_v32 = vsel %vm764_vm5, 0.0, %v2184_v13  ;;  %v1909_v52 = vld [vmem:[%s2541_s1 + $0x158] ss:$12 sps:$4 sm:$0xff]  }
 0x129   :  { %v745_v60 = vadd.f32 %v704_v57, %v345_v51  ;;  %1318 = vmatprep.subr.bf16.mxu1 %v1901_v15  ;;  %v1919_v57 = vld [vmem:[%s2541_s1 + $0x16c] ss:$12 sps:$4 sm:$0xff]  }
 0x12a   :  { %v703_v63 = vsel %vm700_vm0, %v696_v50, %v697_v58  ;;  %v1915_v50 = vld [vmem:[%s2541_s1 + $0x154] ss:$12 sps:$4 sm:$0xff]  }
 0x12b   :  { %v2233_v2 = vadd.f32 %v784_v11, %v745_v60  ;;  %v746_v3 = vadd.f32 %v703_v63, %v349_v59  ;;  %v1890_v11 = vld [vmem:[%s2541_s1 + $0xf8] ss:$12 sps:$4 sm:$0xff]   ;;  %v1916_v59 = vld [vmem:[%s2541_s1 + $0x170] ss:$12 sps:$4 sm:$0xff]   ;;  %v1917_v60 = vld [vmem:[%s2541_s1 + $0x168] ss:$12 sps:$4 sm:$0xff]  }
 0x12c   :  { %1809 = vmatpush3.bf16.msra.mxu0 %v1890_v11 }
 0x12d   :  { %v2236_v6 = vadd.f32 %v783_v16, %v746_v3  ;;  %v353_v8 = vpop.f32.mrb[28].mxu0  ;;  %v1899_v16 = vld [vmem:[%s2541_s1 + $0xf0] ss:$12 sps:$4 sm:$0xff]   ;;  %1810 = vmatprep.subr.bf16.mxu0 %v1957_v54 }
 0x12e   :  { %v698_v17 = vrot.slane %v353_v8, 7  ;;  %v355_v18 = vpop.f32.mrb[29].mxu0  ;;  %1319 = vmatpush1.bf16.msra.mxu1 %v1899_v16 }
 0x12f   :  { %v357_v19 = vpop.f32.mrb[30].mxu0  ;;  %1320 = vmatprep.subr.bf16.mxu1 %v1905_v23 }
 0x130   :  { %v702_v41 = vsel %vm700_vm0, %v697_v58, %v698_v17  ;;  %v699_v21 = vrot.slane %v357_v19, 7  ;;  %v359_v44 = vpop.f32.mrb[31].mxu0  ;;  %1811 = vmatpush3.bf16.msra.mxu0 %v1891_v28 }
 0x131   :  { %v747_v22 = vadd.f32 %v702_v41, %v355_v18  ;;  %1812 = vmatprep.subr.bf16.mxu0 %v1957_v54 }
 0x132   :  { %v716_v24 = vsel %vm700_vm0, %v699_v21, %v684_v39  ;;  %v701_v27 = vsel %vm700_vm0, %v698_v17, %v699_v21  ;;  %1321 = vmatpush1.bf16.msra.mxu1 %v1903_v29 }
 0x133   :  { %v2271_v30 = vadd.f32 %v2178_v10, %v747_v22  ;;  %v717_v35 = vsel %vm2250_vm4, 0.0, %v716_v24  ;;  %v748_v39 = vadd.f32 %v701_v27, %v359_v44  ;;  %1322 = vmatprep.subr.bf16.mxu1 %v1908_v38 }
 0x134   :  { %v733_v31 = vadd.f32 %v717_v35, %v2104_v36  ;;  %v1906_v36 = vld [vmem:[%s2541_s1 + $0x120] ss:$12 sps:$4 sm:$0xff]   ;;  %1813 = vmatpush3.bf16.msra.mxu0 %v1895_v40 }
 0x135   :  { %v2277_v37 = vadd.f32 %v813_v32, %v748_v39  ;;  %1814 = vmatprep.subr.bf16.mxu0 %v1957_v54 }
 0x136   :  { %v814_v10 = vadd.f32 %v2124_v53, %v733_v31  ;;  %1323 = vmatpush1.bf16.msra.mxu1 %v1906_v36 }
 0x137   :  { %1324 = vmatprep.subr.bf16.mxu1 %v1912_v48 }
 0x138   :  { %v830_v13 = vadd.f32 %v2126_v55, %v814_v10  ;;  %1815 = vmatpush3.bf16.msra.mxu0 %v1902_v46 }
 0x139   :  { %1816 = vmatprep.subr.bf16.mxu0 %v1957_v54 }
 0x13a   :  { %v831_v53 = vadd.f32 %v830_v13, %v2132_v7  ;;  %1325 = vmatpush1.bf16.msra.mxu1 %v1910_v49 }
 0x13b   :  { %1326 = vmatprep.subr.bf16.mxu1 %v1915_v50 }
 0x13c   :  { %v832_v51 = vadd.f32 %v831_v53, %v2138_v12  ;;  %1817 = vmatpush3.bf16.msra.mxu0 %v1909_v52 }
 0x13d   :  { %1818 = vmatprep.subr.bf16.mxu0 %v1957_v54 }
 0x13e   :  { %v833_v42 = vadd.f32 %v832_v51, %v2149_v33  ;;  %1327 = vmatpush1.bf16.msra.mxu1 %v1913_v56 }
 0x13f   :  { %1328 = vmatprep.subr.bf16.mxu1 %v1919_v57 }
 0x140   :  { %v834_v58 = vadd.f32 %v833_v42, %v2155_v43  ;;  %1819 = vmatpush3.bf16.msra.mxu0 %v1916_v59 }
 0x142   :  { %v835_v61 = vadd.f32 %v834_v58, %v2172_v5  ;;  %1329 = vmatpush1.bf16.msra.mxu1 %v1917_v60 }
 0x143   :  { %1824 = vmatprep.subr.bf16.mxu1 %v1957_v54 }
 0x144   :  { %v836_v62 = vadd.f32 %v835_v61, %v2186_v14 }
 0x146   :  { %v837_v63 = vadd.f32 %v836_v62, %v2196_v25 }
 0x148   :  { %v838_v0 = vadd.f32 %v837_v63, %v2198_v26 }
 0x14a   :  { %v839_v1 = vadd.f32 %v838_v0, %v2204_v45 }
 0x14c   :  { %v840_v3 = vadd.f32 %v839_v1, %v2206_v47 }
 0x14e   :  { %v841_v4 = vadd.f32 %v840_v3, %v2233_v2 }
 0x150   :  { %v842_v8 = vadd.f32 %v841_v4, %v2236_v6 }
 0x152   :  { %v843_v9 = vadd.f32 %v842_v8, %v2271_v30 }
 0x154   :  { %v844_v15 = vadd.f32 %v843_v9, %v2277_v37 }
 0x156   :  { %v845_v17 = vrot.slane %v844_v15, 4 }
 0x158   :  { %v846_v18 = vadd.f32 %v845_v17, %v844_v15 }
 0x15a   :  { %v847_v11 = vrot.slane %v846_v18, 2 }
 0x15c   :  { %v848_v16 = vadd.f32 %v847_v11, %v846_v18  ;;  %v1667_v18 = vld [vmem:[%s2542_s2] ss:$0 sm:$0xff] }
 0x15e   :  { %v849_v19 = vrot.slane %v848_v16, 1 }
 0x160   :  { %v850_v41 = vadd.f32 %v849_v19, %v848_v16 }
 0x162   :  { %v851_v20 = vmul.f32 0.0078125, %v850_v41 }
 0x164   :  { %v2338_v21 = vsub.f32 %v814_v10, %v851_v20  ;;  %v2341_v44 = vsub.f32 %v2126_v55, %v851_v20  ;;  %v2344_v22 = vsub.f32 %v2132_v7, %v851_v20  ;;  %v2347_v23 = vsub.f32 %v2138_v12, %v851_v20 }
 0x165   :  { %v2350_v24 = vsub.f32 %v2149_v33, %v851_v20  ;;  %v2353_v27 = vsub.f32 %v2155_v43, %v851_v20  ;;  %v2356_v28 = vsub.f32 %v2172_v5, %v851_v20  ;;  %v2359_v29 = vsub.f32 %v2186_v14, %v851_v20 }
 0x166   :  { %v860_v55 = vsub.f32 %v2196_v25, %v851_v20  ;;  %v861_v7 = vsub.f32 %v2198_v26, %v851_v20  ;;  %v862_v35 = vsub.f32 %v2204_v45, %v851_v20  ;;  %v863_v12 = vsub.f32 %v2206_v47, %v851_v20 }
 0x167   :  { %v864_v33 = vsub.f32 %v2233_v2, %v851_v20  ;;  %v865_v39 = vsub.f32 %v2236_v6, %v851_v20  ;;  %v866_v43 = vsub.f32 %v2271_v30, %v851_v20  ;;  %v867_v5 = vsub.f32 %v2277_v37, %v851_v20 }
 0x168   :  { %v868_v14 = vmul.f32 %v2338_v21, %v2338_v21  ;;  %v869_v25 = vmul.f32 %v2341_v44, %v2341_v44  ;;  %v870_v26 = vmul.f32 %v2344_v22, %v2344_v22  ;;  %v871_v47 = vmul.f32 %v2347_v23, %v2347_v23 }
 0x169   :  { %v872_v6 = vmul.f32 %v2350_v24, %v2350_v24  ;;  %v873_v31 = vmul.f32 %v2353_v27, %v2353_v27  ;;  %v874_v37 = vmul.f32 %v2356_v28, %v2356_v28  ;;  %v875_v10 = vmul.f32 %v2359_v29, %v2359_v29 }
 0x16a   :  { %v884_v45 = vadd.f32 %v869_v25, %v868_v14  ;;  %v876_v36 = vmul.f32 %v860_v55, %v860_v55  ;;  %v877_v48 = vmul.f32 %v861_v7, %v861_v7  ;;  %v878_v46 = vmul.f32 %v862_v35, %v862_v35 }
 0x16b   :  { %v879_v50 = vmul.f32 %v863_v12, %v863_v12  ;;  %v880_v52 = vmul.f32 %v864_v33, %v864_v33  ;;  %v881_v42 = vmul.f32 %v865_v39, %v865_v39  ;;  %v882_v58 = vmul.f32 %v866_v43, %v866_v43 }
 0x16c   :  { %v885_v2 = vadd.f32 %v884_v45, %v870_v26  ;;  %v883_v60 = vmul.f32 %v867_v5, %v867_v5  ;;  %v1668_v45 = vld [vmem:[%s2543_s3] ss:$0 sm:$0xff] }
 0x16e   :  { %v886_v30 = vadd.f32 %v885_v2, %v871_v47 }
 0x170   :  { %v887_v32 = vadd.f32 %v886_v30, %v872_v6 }
 0x172   :  { %v888_v38 = vadd.f32 %v887_v32, %v873_v31 }
 0x174   :  { %v889_v40 = vadd.f32 %v888_v38, %v874_v37 }
 0x176   :  { %v890_v13 = vadd.f32 %v889_v40, %v875_v10 }
 0x178   :  { %v891_v53 = vadd.f32 %v890_v13, %v876_v36 }
 0x17a   :  { %v892_v49 = vadd.f32 %v891_v53, %v877_v48 }
 0x17c   :  { %v893_v51 = vadd.f32 %v892_v49, %v878_v46 }
 0x17e   :  { %v894_v56 = vadd.f32 %v893_v51, %v879_v50 }
 0x180   :  { %v895_v57 = vadd.f32 %v894_v56, %v880_v52 }
 0x182   :  { %v896_v59 = vadd.f32 %v895_v57, %v881_v42 }
 0x184   :  { %v897_v61 = vadd.f32 %v896_v59, %v882_v58 }
 0x186   :  { %v898_v62 = vadd.f32 %v897_v61, %v883_v60 }
 0x188   :  { %v899_v63 = vrot.slane %v898_v62, 4 }
 0x18a   :  { %v900_v0 = vadd.f32 %v899_v63, %v898_v62 }
 0x18c   :  { %v901_v1 = vrot.slane %v900_v0, 2 }
 0x18e   :  { %v902_v3 = vadd.f32 %v901_v1, %v900_v0 }
 0x190   :  { %v903_v4 = vrot.slane %v902_v3, 1 }
 0x192   :  { %v904_v8 = vadd.f32 %v903_v4, %v902_v3 }
 0x194   :  { %v905_v9 = vmul.f32 0.0078125, %v904_v8 }
 0x196   :  { %v906_v15 = vadd.f32 1e-05, %v905_v9 }
 0x198   :  { %1928 = vrsqrt.f32 %v906_v15 }
 0x1a2   :  { %v1929_v17 = vpop.eup %1928 }
 0x1a3   :  { %v916_v11 = vmul.f32 %v1929_v17, %v860_v55  ;;  %v917_v16 = vmul.f32 %v1929_v17, %v861_v7  ;;  %v918_v19 = vmul.f32 %v1929_v17, %v862_v35  ;;  %v919_v41 = vmul.f32 %v1929_v17, %v863_v12 }
 0x1a4   :  { %v920_v20 = vmul.f32 %v1929_v17, %v864_v33  ;;  %v921_v14 = vmul.f32 %v1929_v17, %v865_v39  ;;  %v922_v25 = vmul.f32 %v1929_v17, %v866_v43  ;;  %v923_v26 = vmul.f32 %v1929_v17, %v867_v5 }
 0x1a5   :  { %v939_v47 = vmul.f32 %v1667_v18, %v916_v11  ;;  %v940_v2 = vmul.f32 %v1667_v18, %v917_v16  ;;  %v941_v6 = vmul.f32 %v1667_v18, %v918_v19  ;;  %v942_v30 = vmul.f32 %v1667_v18, %v919_v41 }
 0x1a6   :  { %v943_v31 = vmul.f32 %v1667_v18, %v920_v20  ;;  %v944_v32 = vmul.f32 %v1667_v18, %v921_v14  ;;  %v945_v37 = vmul.f32 %v1667_v18, %v922_v25  ;;  %v946_v38 = vmul.f32 %v1667_v18, %v923_v26 }
 0x1a7   :  { %v2391_v55 = vadd.f32 %v1668_v45, %v939_v47  ;;  %v963_v7 = vadd.f32 %v1668_v45, %v940_v2  ;;  %v964_v35 = vadd.f32 %v1668_v45, %v941_v6  ;;  %v965_v12 = vadd.f32 %v1668_v45, %v942_v30 }
 0x1a8   :  { %v966_v33 = vadd.f32 %v1668_v45, %v943_v31  ;;  %v2393_v39 = vadd.f32 %v1668_v45, %v944_v32  ;;  %v2395_v43 = vadd.f32 %v1668_v45, %v945_v37  ;;  %v969_v5 = vadd.f32 %v1668_v45, %v946_v38 }
 0x1a9   :  { %v979_v10 = vmax.f32 %v963_v7, 0.0  ;;  %v980_v40 = vmax.f32 %v964_v35, 0.0  ;;  %v978_v36 = vmax.f32 %v2391_v55, 0.0  ;;  %v981_v13 = vmax.f32 %v965_v12, 0.0 }
 0x1aa   :  { %v982_v48 = vmax.f32 %v966_v33, 0.0  ;;  %v985_v53 = vmax.f32 %v969_v5, 0.0  ;;  %v983_v46 = vmax.f32 %v2393_v39, 0.0  ;;  %v984_v49 = vmax.f32 %v2395_v43, 0.0 }
 0x1ab   :  { %v1040_v50 = vrot.slane %v979_v10, 4  ;;  %v1046_v51 = vrot.slane %v980_v40, 4  ;;  %v2402_v56 = vrot.slane %v978_v36, 4  ;;  %v1052_v42 = vrot.slane %v981_v13, 4 }
 0x1ac   :  { %v1076_v52 = vrot.slane %v985_v53, 4  ;;  %v1058_v57 = vrot.slane %v982_v48, 4  ;;  %v2408_v59 = vrot.slane %v983_v46, 4  ;;  %v2412_v60 = vrot.slane %v984_v49, 4 }
 0x1ad   :  { %v2404_v58 = vmax.f32 %v979_v10, %v1040_v50  ;;  %v908_v61 = vmul.f32 %v1929_v17, %v2338_v21  ;;  %v2415_v62 = vmax.f32 %v980_v40, %v1046_v51  ;;  %v909_v0 = vmul.f32 %v1929_v17, %v2341_v44 }
 0x1ae   :  { %v1077_v63 = vmax.f32 %v985_v53, %v1076_v52  ;;  %v910_v1 = vmul.f32 %v1929_v17, %v2344_v22  ;;  %v911_v3 = vmul.f32 %v1929_v17, %v2347_v23  ;;  %v912_v4 = vmul.f32 %v1929_v17, %v2350_v24 }
 0x1af   :  { %v913_v8 = vmul.f32 %v1929_v17, %v2353_v27  ;;  %v914_v9 = vmul.f32 %v1929_v17, %v2356_v28  ;;  %v2423_v15 = vmax.f32 %v981_v13, %v1052_v42  ;;  %v915_v11 = vmul.f32 %v1929_v17, %v2359_v29 }
 0x1b0   :  { %v931_v21 = vmul.f32 %v1667_v18, %v908_v61  ;;  %v932_v16 = vmul.f32 %v1667_v18, %v909_v0  ;;  %v933_v19 = vmul.f32 %v1667_v18, %v910_v1  ;;  %v934_v41 = vmul.f32 %v1667_v18, %v911_v3 }
 0x1b1   :  { %v935_v20 = vmul.f32 %v1667_v18, %v912_v4  ;;  %v936_v44 = vmul.f32 %v1667_v18, %v913_v8  ;;  %v1078_v14 = vrot.slane %v1077_v63, 2  ;;  %v937_v22 = vmul.f32 %v1667_v18, %v914_v9 }
 0x1b2   :  { %v938_v25 = vmul.f32 %v1667_v18, %v915_v11  ;;  %v954_v23 = vadd.f32 %v1668_v45, %v931_v21  ;;  %v955_v26 = vadd.f32 %v1668_v45, %v932_v16  ;;  %v956_v24 = vadd.f32 %v1668_v45, %v933_v19 }
 0x1b3   :  { %v957_v47 = vadd.f32 %v1668_v45, %v934_v41  ;;  %v958_v27 = vadd.f32 %v1668_v45, %v935_v20  ;;  %v2426_v2 = vmax.f32 %v982_v48, %v1058_v57  ;;  %v959_v28 = vadd.f32 %v1668_v45, %v936_v44 }
 0x1b4   :  { %v960_v6 = vadd.f32 %v1668_v45, %v937_v22  ;;  %v961_v30 = vadd.f32 %v1668_v45, %v938_v25  ;;  %v970_v29 = vmax.f32 %v954_v23, 0.0  ;;  %v971_v17 = vmax.f32 %v955_v26, 0.0 }
 0x1b5   :  { %v972_v31 = vmax.f32 %v956_v24, 0.0  ;;  %v973_v32 = vmax.f32 %v957_v47, 0.0  ;;  %v2428_v37 = vmax.f32 %v1077_v63, %v1078_v14  ;;  %v974_v38 = vmax.f32 %v958_v27, 0.0 }
 0x1b6   :  { %v975_v7 = vmax.f32 %v959_v28, 0.0  ;;  %v976_v35 = vmax.f32 %v960_v6, 0.0  ;;  %v977_v18 = vmax.f32 %v961_v30, 0.0  ;;  %v986_v12 = vrot.slane %v970_v29, 4 }
 0x1b7   :  { %v992_v33 = vrot.slane %v971_v17, 4  ;;  %v998_v5 = vrot.slane %v972_v31, 4  ;;  %v1004_v10 = vrot.slane %v973_v32, 4  ;;  %v1010_v40 = vrot.slane %v974_v38, 4 }
 0x1b8   :  { %v1016_v13 = vrot.slane %v975_v7, 4  ;;  %v1022_v48 = vrot.slane %v976_v35, 4  ;;  %v987_v53 = vmax.f32 %v970_v29, %v986_v12  ;;  %v1028_v51 = vrot.slane %v977_v18, 4 }
 0x1b9   :  { %v993_v50 = vmax.f32 %v971_v17, %v992_v33  ;;  %v999_v45 = vmax.f32 %v972_v31, %v998_v5  ;;  %v1005_v52 = vmax.f32 %v973_v32, %v1004_v10  ;;  %v1011_v42 = vmax.f32 %v974_v38, %v1010_v40 }
 0x1ba   :  { %v1017_v57 = vmax.f32 %v975_v7, %v1016_v13  ;;  %v1023_v61 = vmax.f32 %v976_v35, %v1022_v48  ;;  %v988_v63 = vrot.slane %v987_v53, 2  ;;  %v1029_v3 = vmax.f32 %v977_v18, %v1028_v51 }
 0x1bb   :  { %v994_v0 = vrot.slane %v993_v50, 2  ;;  %v1000_v1 = vrot.slane %v999_v45, 2  ;;  %v1006_v4 = vrot.slane %v1005_v52, 2  ;;  %v1012_v8 = vrot.slane %v1011_v42, 2 }
 0x1bc   :  { %v1018_v9 = vrot.slane %v1017_v57, 2  ;;  %v1024_v11 = vrot.slane %v1023_v61, 2  ;;  %v989_v21 = vmax.f32 %v987_v53, %v988_v63  ;;  %v1030_v41 = vrot.slane %v1029_v3, 2 }
 0x1bd   :  { %v995_v16 = vmax.f32 %v993_v50, %v994_v0  ;;  %v1001_v19 = vmax.f32 %v999_v45, %v1000_v1  ;;  %v1035_v20 = vmax.f32 %v978_v36, %v2402_v56  ;;  %v1007_v44 = vmax.f32 %v1005_v52, %v1006_v4 }
 0x1be   :  { %v1013_v14 = vmax.f32 %v1011_v42, %v1012_v8  ;;  %v1019_v22 = vmax.f32 %v1017_v57, %v1018_v9  ;;  %v1042_v25 = vrot.slane %v2404_v58, 2  ;;  %v1048_v23 = vrot.slane %v2415_v62, 2 }
 0x1bf   :  { %v990_v26 = vrot.slane %v989_v21, 1  ;;  %v996_v24 = vrot.slane %v995_v16, 1  ;;  %v1054_v47 = vrot.slane %v2423_v15, 2  ;;  %v1060_v27 = vrot.slane %v2426_v2, 2 }
 0x1c0   :  { %v1065_v28 = vmax.f32 %v983_v46, %v2408_v59  ;;  %v1071_v55 = vmax.f32 %v984_v49, %v2412_v60  ;;  %v1080_v36 = vrot.slane %v2428_v37, 1  ;;  %v1002_v56 = vrot.slane %v1001_v19, 1 }
 0x1c1   :  { %v1025_v6 = vmax.f32 %v1023_v61, %v1024_v11  ;;  %v1031_v30 = vmax.f32 %v1029_v3, %v1030_v41  ;;  %v991_v29 = vmax.f32 %v989_v21, %v990_v26  ;;  %v1008_v17 = vrot.slane %v1007_v44, 1 }
 0x1c2   :  { %v1014_v31 = vrot.slane %v1013_v14, 1  ;;  %v1020_v32 = vrot.slane %v1019_v22, 1  ;;  %v997_v38 = vmax.f32 %v995_v16, %v996_v24  ;;  %v1036_v7 = vrot.slane %v1035_v20, 2 }
 0x1c3   :  { %v1043_v35 = vmax.f32 %v2404_v58, %v1042_v25  ;;  %v1049_v39 = vmax.f32 %v2415_v62, %v1048_v23  ;;  %v1055_v46 = vmax.f32 %v2423_v15, %v1054_v47  ;;  %v1061_v43 = vmax.f32 %v2426_v2, %v1060_v27 }
 0x1c4   :  { %v1066_v49 = vrot.slane %v1065_v28, 2  ;;  %v1072_v59 = vrot.slane %v1071_v55, 2  ;;  %v1003_v60 = vmax.f32 %v1001_v19, %v1002_v56  ;;  %v1037_v18 = vmax.f32 %v1035_v20, %v1036_v7 }
 0x1c5   :  { %v1044_v12 = vrot.slane %v1043_v35, 1  ;;  %v1050_v33 = vrot.slane %v1049_v39, 1  ;;  %v1056_v5 = vrot.slane %v1055_v46, 1  ;;  %v1062_v10 = vrot.slane %v1061_v43, 1 }
 0x1c6   :  { %v1067_v40 = vmax.f32 %v1065_v28, %v1066_v49  ;;  %v1073_v13 = vmax.f32 %v1071_v55, %v1072_v59  ;;  %v1026_v48 = vrot.slane %v1025_v6, 1  ;;  %v1038_v53 = vrot.slane %v1037_v18, 1 }
 0x1c7   :  { %v1045_v58 = vmax.f32 %v1043_v35, %v1044_v12  ;;  %v1051_v50 = vmax.f32 %v1049_v39, %v1050_v33  ;;  %v1009_v62 = vmax.f32 %v1007_v44, %v1008_v17  ;;  %v1032_v15 = vrot.slane %v1031_v30, 1 }
 0x1c8   :  { %v1068_v45 = vrot.slane %v1067_v40, 1  ;;  %v1074_v2 = vrot.slane %v1073_v13, 1  ;;  %v1039_v51 = vmax.f32 %v1037_v18, %v1038_v53  ;;  %v1057_v52 = vmax.f32 %v1055_v46, %v1056_v5 }
 0x1c9   :  { %v1082_v42 = vpack.c.bf16 %v991_v29, %v991_v29  ;;  %v1083_v57 = vpack.c.bf16 %v997_v38, %v997_v38  ;;  %v1015_v61 = vmax.f32 %v1013_v14, %v1014_v31  ;;  %v1021_v63 = vmax.f32 %v1019_v22, %v1020_v32 }
 0x1ca   :  { %v1063_v0 = vmax.f32 %v1061_v43, %v1062_v10  ;;  %v1084_v1 = vpack.c.bf16 %v1003_v60, %v1003_v60  ;;  %v1069_v3 = vmax.f32 %v1067_v40, %v1068_v45  ;;  %v1090_v4 = vpack.c.bf16 %v1039_v51, %v1039_v51  ;;  %v1923_v45 = vld [vmem:[%s2544_s4 + $0x18] sm:$0xff]   ;;  %v1925_v51 = vld [vmem:[%s2544_s4 + $0x28] sm:$0xff]  }
 0x1cb   :  { %v1091_v8 = vpack.c.bf16 %v1045_v58, %v1045_v58  ;;  %v1092_v9 = vpack.c.bf16 %v1051_v50, %v1051_v50  ;;  %v1081_v11 = vmax.f32 %v2428_v37, %v1080_v36  ;;  %v1027_v21 = vmax.f32 %v1025_v6, %v1026_v48  ;;  %v1920_v50 = vld [vmem:[%s2544_s4] sm:$0xff]  }
 0x1cc   :  { %v1033_v16 = vmax.f32 %v1031_v30, %v1032_v15  ;;  %v1075_v19 = vmax.f32 %v1073_v13, %v1074_v2  ;;  %v1085_v41 = vpack.c.bf16 %v1009_v62, %v1009_v62  ;;  %v1093_v20 = vpack.c.bf16 %v1057_v52, %v1057_v52  ;;  %v1921_v62 = vld [vmem:[%s2544_s4 + $0x8] sm:$0xff]   ;;  %v1922_v15 = vld [vmem:[%s2544_s4 + $0x10] sm:$0xff]   ;;  %v1924_v2 = vld [vmem:[%s2544_s4 + $0x20] sm:$0xff]  }
 0x1cd   :  { %v1147_v44 = vunpack.c.l.b16 %v1082_v42  ;;  %v1148_v25 = vunpack.c.l.b16 %v1083_v57  ;;  %v1086_v14 = vpack.c.bf16 %v1015_v61, %v1015_v61  ;;  %v1087_v22 = vpack.c.bf16 %v1021_v63, %v1021_v63  ;;  %v1926_v52 = vld [vmem:[%s2544_s4 + $0x30] sm:$0xff]   ;;  %v1927_v42 = vld [vmem:[%s2544_s4 + $0x38] sm:$0xff]  }
 0x1ce   :  { %v1094_v23 = vpack.c.bf16 %v1063_v0, %v1063_v0  ;;  %v1149_v26 = vunpack.c.l.b16 %v1084_v1  ;;  %v1095_v24 = vpack.c.bf16 %v1069_v3, %v1069_v3  ;;  %v1155_v47 = vunpack.c.l.b16 %v1090_v4 }
 0x1cf   :  { %v1156_v27 = vunpack.c.l.b16 %v1091_v8  ;;  %v1157_v28 = vunpack.c.l.b16 %v1092_v9  ;;  %v1097_v55 = vpack.c.bf16 %v1081_v11, %v1081_v11  ;;  %v1088_v56 = vpack.c.bf16 %v1027_v21, %v1027_v21 }
 0x1d0   :  { %v1089_v29 = vpack.c.bf16 %v1033_v16, %v1033_v16  ;;  %v1096_v37 = vpack.c.bf16 %v1075_v19, %v1075_v19  ;;  %v1150_v36 = vunpack.c.l.b16 %v1085_v41  ;;  %v1158_v6 = vunpack.c.l.b16 %v1093_v20 }
 0x1d1   :  { %v1164_v30 = vsel %vm1163_vm7, %v1148_v25, %v1147_v44  ;;  %v1177_v17 = vsel %vm1163_vm7, %v1156_v27, %v1155_v47  ;;  %v1151_v31 = vunpack.c.l.b16 %v1086_v14  ;;  %v1159_v32 = vunpack.c.l.b16 %v1094_v23 }
 0x1d2   :  { %v1166_v38 = vsel %vm1165_vm8, %v1149_v26, %v1164_v30  ;;  %v1178_v7 = vsel %vm1165_vm8, %v1157_v28, %v1177_v17  ;;  %v1152_v35 = vunpack.c.l.b16 %v1087_v22  ;;  %v1160_v39 = vunpack.c.l.b16 %v1095_v24 }
 0x1d3   :  { %v1168_v46 = vsel %vm1167_vm9, %v1150_v36, %v1166_v38  ;;  %v1179_v43 = vsel %vm1167_vm9, %v1158_v6, %v1178_v7  ;;  %v1153_v49 = vunpack.c.l.b16 %v1088_v56  ;;  %v1161_v59 = vunpack.c.l.b16 %v1096_v37 }
 0x1d4   :  { %v1170_v60 = vsel %vm1169_vm10, %v1151_v31, %v1168_v46  ;;  %v1180_v18 = vsel %vm1169_vm10, %v1159_v32, %v1179_v43  ;;  %v1154_v12 = vunpack.c.l.b16 %v1089_v29  ;;  %v1162_v33 = vunpack.c.l.b16 %v1097_v55 }
 0x1d5   :  { %v1172_v5 = vsel %vm1171_vm11, %v1152_v35, %v1170_v60  ;;  %v1181_v10 = vsel %vm1171_vm11, %v1160_v39, %v1180_v18  ;;  %v461_v57 = vadd.s32 8, %v2100_v34  ;;  %v1402_v61 = vand.u32 7, %v2100_v34 }
 0x1d6   :  { %v1174_v40 = vsel %vm1173_vm12, %v1153_v49, %v1172_v5  ;;  %v1182_v13 = vsel %vm1173_vm12, %v1161_v59, %v1181_v10 }
 0x1d7   :  { %v1176_v48 = vsel %vm1175_vm13, %v1154_v12, %v1174_v40  ;;  %v1183_v53 = vsel %vm1175_vm13, %v1162_v33, %v1182_v13  ;;  %v1409_v63 = vand.u32 7, %v461_v57  ;;  %vm2498_vm14 = vcmp.eq.s32.totalorder %v1402_v61, 0  ;;  %v1726_v40 = vld [vmem:[%s2542_s2 + $0x1] ss:$0 sm:$0xff] }
 0x1d8   :  { %v1184_v58 = vpack.c.b16 %v1183_v53, %v1176_v48  ;;  %vm1432_vm2 = vcmp.eq.s32.totalorder %v1402_v61, 7  ;;  %v1728_v53 = vld [vmem:[%s2543_s3 + $0x1] ss:$0 sm:$0xff] }
 0x1d9   :  { %vm2502_vm15 = vcmp.eq.s32.totalorder %v1409_v63, 0  ;;  %vm1433_vm3 = vcmp.eq.s32.totalorder %v1409_v63, 7 }
 0x1da   :  { %1347 = vmatmul.mubr.bf16.vlgmr.msra.gmra.mrb[16].mxu1 %v1184_v58  ;;  %1821 = vmatmul.mubr.bf16.vlgmr.msra.gmra.mrb[32].mxu0 %v1184_v58 }
 0x1db   :  { %1840 = vmatprep.mubr.msk.bf16.mxu1 %vm1958_vm6, %v1957_v54  ;;  %1825 = vmatpush3.bf16.msra.mxu1 %v1920_v50 }
 0x1dc   :  { %1826 = vmatprep.subr.bf16.mxu1 %v1957_v54 }
 0x1df   :  { %1827 = vmatpush3.bf16.msra.mxu1 %v1921_v62 }
 0x1e0   :  { %1828 = vmatprep.subr.bf16.mxu1 %v1957_v54 }
 0x1e3   :  { %1829 = vmatpush3.bf16.msra.mxu1 %v1922_v15 }
 0x1e4   :  { %1830 = vmatprep.subr.bf16.mxu1 %v1957_v54 }
 0x1e7   :  { %1831 = vmatpush3.bf16.msra.mxu1 %v1923_v45 }
 0x1e8   :  { %1832 = vmatprep.subr.bf16.mxu1 %v1957_v54 }
 0x1eb   :  { %1833 = vmatpush3.bf16.msra.mxu1 %v1924_v2 }
 0x1ec   :  { %1834 = vmatprep.subr.bf16.mxu1 %v1957_v54 }
 0x1ef   :  { %1835 = vmatpush3.bf16.msra.mxu1 %v1925_v51 }
 0x1f0   :  { %1836 = vmatprep.subr.bf16.mxu1 %v1957_v54 }
 0x1f3   :  { %1837 = vmatpush3.bf16.msra.mxu1 %v1926_v52 }
 0x1f4   :  { %1838 = vmatprep.subr.bf16.mxu1 %v1957_v54 }
 0x1f7   :  { %1839 = vmatpush3.bf16.msra.mxu1 %v1927_v42 }
 0x2ad   :  { %v1348_v0 = vpop.f32.mrb[16].mxu1  ;;  %v1391_v1 = vpop.f32.mrb[32].mxu0 }
 0x2ae   :  { %v1350_v3 = vpop.f32.mrb[17].mxu1  ;;  %v1822_v4 = vpop.f32.mrb[33].mxu0  ;;  %v1424_v54 = vrot.slane %v1348_v0, 7  ;;  %v1434_v16 = vrot.slane %v1391_v1, 1 }
 0x2af   :  { %v1352_v8 = vpop.f32.mrb[18].mxu1  ;;  %v1394_v11 = vpop.f32.mrb[34].mxu0 }
 0x2b0   :  { %v1425_v19 = vrot.slane %v1352_v8, 7  ;;  %v1435_v41 = vrot.slane %v1394_v11, 1  ;;  %v1354_v20 = vpop.f32.mrb[19].mxu1  ;;  %v1823_v44 = vpop.f32.mrb[35].mxu0 }
 0x2b2   :  { %v1427_v25 = vsel %vm700_vm0, %v1425_v19, %v1424_v54  ;;  %v1436_v14 = vsel %vm781_vm1, %v1434_v16, %v1435_v41  ;;  %v1426_v22 = vsel %vm700_vm0, %v1424_v54, %v1425_v19  ;;  %v1437_v23 = vsel %vm781_vm1, %v1435_v41, %v1434_v16 }
 0x2b3   :  { %v1428_v26 = vsel %vm2498_vm14, 0.0, %v1427_v25  ;;  %v1429_v24 = vsel %vm2502_vm15, 0.0, %v1426_v22  ;;  %v1438_v28 = vsel %vm1432_vm2, 0.0, %v1436_v14  ;;  %v1439_v55 = vsel %vm1433_vm3, 0.0, %v1437_v23 }
 0x2b4   :  { %v1430_v47 = vadd.f32 %v1428_v26, %v1350_v3  ;;  %v1431_v27 = vadd.f32 %v1429_v24, %v1354_v20  ;;  %v1729_v20 = vld [vmem:[%s2545_s5] ss:$0 sm:$0xff] }
 0x2b6   :  { %v1440_v56 = vadd.f32 %v1438_v28, %v1430_v47  ;;  %v1441_v29 = vadd.f32 %v1439_v55, %v1431_v27 }
 0x2b8   :  { %v1442_v37 = vadd.f32 %v1441_v29, %v1440_v56 }
 0x2ba   :  { %v1443_v36 = vrot.slane %v1442_v37, 4 }
 0x2bc   :  { %v1444_v6 = vadd.f32 %v1443_v36, %v1442_v37 }
 0x2be   :  { %v1445_v30 = vrot.slane %v1444_v6, 2 }
 0x2c0   :  { %v1446_v17 = vadd.f32 %v1445_v30, %v1444_v6 }
 0x2c2   :  { %v1447_v31 = vrot.slane %v1446_v17, 1 }
 0x2c4   :  { %v1448_v34 = vadd.f32 %v1447_v31, %v1446_v17 }
 0x2c6   :  { %v1449_v32 = vmul.f32 0.0625, %v1448_v34 }
 0x2c8   :  { %v1450_v38 = vsub.f32 %v1440_v56, %v1449_v32  ;;  %v1451_v7 = vsub.f32 %v1441_v29, %v1449_v32 }
 0x2ca   :  { %v1452_v35 = vmul.f32 %v1450_v38, %v1450_v38  ;;  %v1453_v39 = vmul.f32 %v1451_v7, %v1451_v7 }
 0x2cc   :  { %v1454_v46 = vadd.f32 %v1453_v39, %v1452_v35 }
 0x2ce   :  { %v1455_v43 = vrot.slane %v1454_v46, 4 }
 0x2d0   :  { %v1456_v49 = vadd.f32 %v1455_v43, %v1454_v46 }
 0x2d2   :  { %v1457_v59 = vrot.slane %v1456_v49, 2 }
 0x2d4   :  { %v1458_v60 = vadd.f32 %v1457_v59, %v1456_v49 }
 0x2d6   :  { %v1459_v18 = vrot.slane %v1458_v60, 1 }
 0x2d8   :  { %v1460_v12 = vadd.f32 %v1459_v18, %v1458_v60 }
 0x2da   :  { %v1461_v33 = vmul.f32 0.0625, %v1460_v12 }
 0x2dc   :  { %v1462_v5 = vadd.f32 1e-05, %v1461_v33 }
 0x2de   :  { %1930 = vrsqrt.f32 %v1462_v5 }
 0x2e8   :  { %v1931_v10 = vpop.eup %1930 }
 0x2e9   :  { %v1464_v13 = vmul.f32 %v1931_v10, %v1450_v38  ;;  %v1465_v48 = vmul.f32 %v1931_v10, %v1451_v7 }
 0x2eb   :  { %v1474_v58 = vmul.f32 %v1726_v40, %v1464_v13  ;;  %v1475_v50 = vmul.f32 %v1726_v40, %v1465_v48 }
 0x2ed   :  { %v1484_v62 = vadd.f32 %v1728_v53, %v1474_v58  ;;  %v1485_v15 = vadd.f32 %v1728_v53, %v1475_v50 }
 0x2ef   :  { %v1486_v45 = vmax.f32 %v1484_v62, 0.0  ;;  %v1487_v2 = vmax.f32 %v1485_v15, 0.0 }
 0x2f1   :  { %v1488_v51 = vrot.slane %v1486_v45, 4  ;;  %v1494_v52 = vrot.slane %v1487_v2, 4 }
 0x2f3   :  { %v1489_v42 = vmax.f32 %v1486_v45, %v1488_v51  ;;  %v1495_v57 = vmax.f32 %v1487_v2, %v1494_v52 }
 0x2f5   :  { %v1490_v61 = vrot.slane %v1489_v42, 2  ;;  %v1496_v63 = vrot.slane %v1495_v57, 2 }
 0x2f7   :  { %v1497_v0 = vmax.f32 %v1495_v57, %v1496_v63  ;;  %v1491_v1 = vmax.f32 %v1489_v42, %v1490_v61 }
 0x2f9   :  { %v1492_v3 = vrot.slane %v1491_v1, 1  ;;  %v1498_v4 = vrot.slane %v1497_v0, 1 }
 0x2fb   :  { %v1493_v8 = vmax.f32 %v1491_v1, %v1492_v3  ;;  %v1499_v9 = vmax.f32 %v1497_v0, %v1498_v4 }
 0x2fd   :  { %v1500_v11 = vpack.c.bf16 %v1493_v8, %v1493_v8  ;;  %v1501_v21 = vpack.c.bf16 %v1499_v9, %v1499_v9 }
 0x2ff   :  { %v1527_v54 = vunpack.c.l.b16 %v1500_v11  ;;  %v1528_v16 = vunpack.c.l.b16 %v1501_v21 }
 0x301   :  { %v1529_v19 = vsel %vm1163_vm7, %v1528_v16, %v1527_v54 }
 0x302   :  { %v1530_v41 = vpack.c.b16 %v1529_v19, %v1529_v19 }
 0x304   :  { %1841 = vmatmul.mubr.bf16.vlgmr.msra.gmra.mrb[20].mxu1 %v1530_v41 }
 0x3d7   :  { %v1614_v44 = vpop.f32.mrb[20].mxu1 }
 0x3d8   :  { %v1615_v25 = vadd.f32 %v1729_v20, %v1614_v44  ;;  %v1842_v14 = vpop.f32.mrb[21].mxu1 }
 0x3d9   :  { %v1617_v22 = vpop.f32.mrb[22].mxu1 }
 0x3da   :  { %1620 = vst [vmem:[#allocation2] sm:$0x3] %v1615_v25  ;;  %v1843_v23 = vpop.f32.mrb[23].mxu1 }
 0x3db   :  { %1943 = shalt.err (!%p1940_p4)
}
 0x3dc   :  { %s1944_s5 = scalar_lea.hbm %s2546_s6, 32 }
 0x3dd   :  { %p1945_p5 = scmp.ne.s32.totalorder %s2546_s6, %s1944_s5  ;;  %p1948_p6 = scmp.lt.u32.totalorder %s1944_s5, %s2546_s6 }
 0x3df   :  { %p1950_p7 = pnand %p1948_p6, %p1945_p5 }
 0x3e1   :  { %1953 = shalt.err (!%p1950_p7)
}
 0x3e2   :  { %1630 = dma.vmem_to_hbm [thread:$0]  %s1628_s9, 32, %s2546_s6, [#allocation3]  }
 0x3e3   :  { %1954 = dma.done.wait [#allocation3], 32  }
 0x3e4   :  { %1955 = vsyncadd [#allocation3], 4294967264 }
 0x3e5   :  { %1634 = vsyncpa [#allocation3], 1 }

</bundles_post_ra>
